<compile_context>
chip_gen: v7x
topology: tpu7x:2x2x1
jax: 0.10.0
libtpu: 0.0.40
codegen_flags: <defaults>
</compile_context>

<pallas_src>
import math

import jax
import jax.numpy as jnp
from jax.experimental import pallas as pl
from jax.experimental.pallas import tpu as pltpu


def _round_up(x, m):
    return ((x + m - 1) // m) * m


def _softplus(x):
    # numerically stable log(1 + exp(x))
    return jnp.maximum(x, 0.0) + jnp.log1p(jnp.exp(-jnp.abs(x)))


def _sigmoid(x):
    # one EUP op (tanh) instead of exp + reciprocal
    return 0.5 * jnp.tanh(0.5 * x) + 0.5


def _vmem_limit_bytes():
    # ~48 MiB on v7x (64 MiB physical VMEM/TC), ~96 MiB on v5e/v6e (128 MiB).
    cap = 64 * 1024 * 1024
    try:
        cap = int(pltpu.get_tpu_info().vmem_capacity_bytes)
    except Exception:
        pass
    return min(cap * 3 // 4, 100 * 1024 * 1024)


def _buffered_spec(block_shape, index_map, depth=3):
    # Deeper input pipeline for message tiles whose HBM blocks are non-adjacent
    # after tile skipping.  Falls back to a plain BlockSpec if this JAX build
    # does not expose pipeline_mode.
    try:
        return pl.BlockSpec(block_shape, index_map, pipeline_mode=pl.Buffered(depth))
    except Exception:
        return pl.BlockSpec(block_shape, index_map)


def _fold_bn1(params, atom_fea_len, eps):
    """Fold eval-mode bn1 into fc_full: returns W_self, W_nbr, W_edge, shift (f32)."""
    W, b = params["W"], params["b"]
    g1, b1, m1, v1 = params["bn1"]
    s1 = g1.astype(jnp.float32) / jnp.sqrt(v1.astype(jnp.float32) + eps)
    Wf = W.T.astype(jnp.float32) * s1[None, :]                       # (Din, 2A)
    shift = (b.astype(jnp.float32) - m1.astype(jnp.float32)) * s1 + b1.astype(jnp.float32)
    A = atom_fea_len
    return Wf[:A], Wf[A:2 * A], Wf[2 * A:], shift


def _fold_bn2(params, eps):
    g2, b2, m2, v2 = params["bn2"]
    s2 = g2.astype(jnp.float32) / jnp.sqrt(v2.astype(jnp.float32) + eps)
    t2 = b2.astype(jnp.float32) - m2.astype(jnp.float32) * s2
    return s2, t2


# --------------------------------------------------------------------------
# Edge kernel: (bn1 folded) fc_full as three MXU matmuls + sigmoid/softplus gate.
#   a_self/a_nbr : (te, A)  bf16   gathered atom features (unpadded feature dim)
#   nbr          : (te, B)  bf16   bond features
#   w1/w2/w3     : (A|B, 2*A_pad)  bf16 folded weights, columns [filter | core]
#   shift        : (1, 2*A_pad)    f32  folded bias + bn1 shift
#   msg          : (te, A_pad)     bf16 gated neighbor messages (lane dense)
# --------------------------------------------------------------------------
def edge_kernel(a_self_ref, a_nbr_ref, nbr_ref, w1_ref, w2_ref, w3_ref,
                shift_ref, msg_ref):
    z = jnp.dot(a_self_ref[...], w1_ref[...], preferred_element_type=jnp.float32)
    z = z + jnp.dot(a_nbr_ref[...], w2_ref[...], preferred_element_type=jnp.float32)
    z = z + jnp.dot(nbr_ref[...], w3_ref[...], preferred_element_type=jnp.float32)
    z = z + shift_ref[...]
    half = msg_ref.shape[1]                     # A_pad (multiple of 128)
    filt = _sigmoid(z[:, :half])
    core = _softplus(z[:, half:])
    msg_ref[...] = (filt * core).astype(msg_ref.dtype)


# --------------------------------------------------------------------------
# Pool kernel: scatter_add over edges via one-hot MXU matmul with data-dependent
# tile skipping, tiled (segment_tiles, edge_tiles) with the edge (reduction)
# axis last, f32 accumulator, fused bn2 + residual + softplus finalize.
# --------------------------------------------------------------------------
def pool_kernel(first_ref, last_ref, idx_ref, msg_ref, atom_ref, s2_ref, t2_ref,
                out_ref, acc_ref):
    s = pl.program_id(0)
    e = pl.program_id(1)

    @pl.when(e == 0)
    def _():
        acc_ref[...] = jnp.zeros_like(acc_ref)

    # Only edge tiles in [first[s], last[s]] can contain edges of this segment
    # tile (exact for sorted self_fea_idx; a conservative superset otherwise --
    # skipped tiles would contribute exactly zero anyway).
    @pl.when(jnp.logical_and(e >= first_ref[s], e <= last_ref[s]))
    def _():
        ts = out_ref.shape[0]
        te = msg_ref.shape[0]
        seg = jax.lax.broadcasted_iota(jnp.int32, (ts, te), 0) + s * ts
        onehot = (seg == idx_ref[...]).astype(msg_ref.dtype)     # exact 0/1 in bf16
        acc_ref[...] += jnp.dot(onehot, msg_ref[...],
                                preferred_element_type=jnp.float32)

    @pl.when(e == pl.num_programs(1) - 1)
    def _():
        y = atom_ref[...].astype(jnp.float32) + acc_ref[...] * s2_ref[...] + t2_ref[...]
        out_ref[...] = _softplus(y).astype(out_ref.dtype)


# --------------------------------------------------------------------------
# Wrapper: gathers / padding / BN folding + the two pallas_calls.
# --------------------------------------------------------------------------
def conv_layer_forward(atom_in_fea, nbr_fea, self_fea_idx, nbr_fea_idx, params,
                       *, edge_tile=512, pool_edge_tile=256, seg_tile=None,
                       compute_dtype=jnp.bfloat16):
    N, A = atom_in_fea.shape
    E, B = nbr_fea.shape
    eps = params.get("eps", 1e-5)
    out_dtype = atom_in_fea.dtype
    cdt = compute_dtype

    # ---- tile sizing ---------------------------------------------------------
    # Edge axis is "parallel": keep >=2 tiles so both v7x TensorCores get work,
    # but never below 128 rows.
    edge_tile = max(128, min(edge_tile, _round_up(-(-E // 2), 128)))
    pool_edge_tile = max(128, pool_edge_tile)
    A_pad = _round_up(A, 128)
    if seg_tile is None:
        # >=2 segment tiles (v7x megacore), capped at 256 (MXU M dim on v6e/v7x)
        seg_tile = min(256, max(8, _round_up(-(-N // 2), 8)))
    ts = _round_up(seg_tile, 8)
    S_pad = _round_up(N, ts)
    n_s = S_pad // ts
    lcm = edge_tile * pool_edge_tile // math.gcd(edge_tile, pool_edge_tile)
    E_pad = _round_up(E, lcm)
    n_ee = E_pad // edge_tile
    n_ep = E_pad // pool_edge_tile
    vmem_limit = _vmem_limit_bytes()

    # ---- fold eval-mode BN into the linear / pooled paths ---------------------
    W1, W2, W3, shift = _fold_bn1(params, A, eps)    # (A,2A),(A,2A),(B,2A),(2A,)
    s2, t2 = _fold_bn2(params, eps)

    def split_pad_cols(x, dtype):
        # (K, 2A) -> (K, 2*A_pad): [filter | core] halves, each lane-padded to A_pad
        return jnp.concatenate(
            [jnp.pad(x[:, :A], ((0, 0), (0, A_pad - A))),
             jnp.pad(x[:, A:], ((0, 0), (0, A_pad - A)))], axis=1).astype(dtype)

    W1_p = split_pad_cols(W1, cdt)
    W2_p = split_pad_cols(W2, cdt)
    W3_p = split_pad_cols(W3, cdt)
    shift_p = split_pad_cols(shift.reshape(1, 2 * A), jnp.float32)   # (1, 2*A_pad)

    # ---- gathers (XLA); edge rows padded to E_pad, feature dims stay unpadded --
    # TODO(synk): fold the row gathers into the edge kernel (scalar-prefetched
    # pl.Element index_maps) when the edge list is contiguous per source atom.
    idx32 = self_fea_idx.astype(jnp.int32)
    pad_n = E_pad - E
    self_idx_p = jnp.pad(idx32, (0, pad_n))                      # pad with atom 0 (any valid row)
    nbr_idx_p = jnp.pad(nbr_fea_idx.astype(jnp.int32), (0, pad_n))
    a_self = jnp.take(atom_in_fea, self_idx_p, axis=0).astype(cdt)    # (E_pad, A)
    a_nbr = jnp.take(atom_in_fea, nbr_idx_p, axis=0).astype(cdt)      # (E_pad, A)
    nbr_p = jnp.pad(nbr_fea, ((0, pad_n), (0, 0))).astype(cdt)        # (E_pad, B)

    dt_sz = jnp.dtype(cdt).itemsize
    edge_cost = pl.CostEstimate(
        flops=2 * E_pad * (2 * A + B) * 2 * A_pad,
        transcendentals=3 * E_pad * A_pad,
        bytes_accessed=(E_pad * (2 * A + B) + (2 * A + B) * 2 * A_pad
                        + E_pad * A_pad) * dt_sz)

    nbr_msg = pl.pallas_call(
        edge_kernel,
        out_shape=jax.ShapeDtypeStruct((E_pad, A_pad), cdt),
        grid_spec=pltpu.PrefetchScalarGridSpec(
            num_scalar_prefetch=0,
            grid=(n_ee,),
            in_specs=[
                pl.BlockSpec((edge_tile, A), lambda e: (e, 0)),
                pl.BlockSpec((edge_tile, A), lambda e: (e, 0)),
                pl.BlockSpec((edge_tile, B), lambda e: (e, 0)),
                pl.BlockSpec((A, 2 * A_pad), lambda e: (0, 0)),
                pl.BlockSpec((A, 2 * A_pad), lambda e: (0, 0)),
                pl.BlockSpec((B, 2 * A_pad), lambda e: (0, 0)),
                pl.BlockSpec((1, 2 * A_pad), lambda e: (0, 0)),
            ],
            out_specs=pl.BlockSpec((edge_tile, A_pad), lambda e: (e, 0)),
        ),
        compiler_params=pltpu.CompilerParams(
            dimension_semantics=("parallel",),
            vmem_limit_bytes=vmem_limit),
        cost_estimate=edge_cost,
    )(a_self, a_nbr, nbr_p, W1_p, W2_p, W3_p, shift_p)

    # ---- pooling with data-dependent edge-tile skipping -----------------------
    # Per-edge-tile [min,max] segment id over REAL edges only, turned into a
    # per-segment-tile [first,last] overlapping edge-tile range.
    idx_min_src = jnp.concatenate([idx32, jnp.full((pad_n,), jnp.int32(2 ** 30))])
    idx_max_src = jnp.concatenate([idx32, jnp.full((pad_n,), jnp.int32(-1))])
    emin = idx_min_src.reshape(n_ep, pool_edge_tile).min(axis=1)
    emax = idx_max_src.reshape(n_ep, pool_edge_tile).max(axis=1)
    seg_lo = jnp.arange(n_s, dtype=jnp.int32) * ts
    overlap = (emin[None, :] <= seg_lo[:, None] + (ts - 1)) & (emax[None, :] >= seg_lo[:, None])
    e_ids = jnp.arange(n_ep, dtype=jnp.int32)
    first_e = jnp.min(jnp.where(overlap, e_ids[None, :], n_ep), axis=1)
    last_e = jnp.max(jnp.where(overlap, e_ids[None, :], -1), axis=1).astype(jnp.int32)
    first_e = jnp.where(last_e >= 0, first_e, 0).astype(jnp.int32)   # no-overlap tiles

    # padded edges point at segment id S_pad (out of range) => contribute nothing.
    idx_p = jnp.pad(idx32, (0, pad_n), constant_values=S_pad).reshape(1, E_pad)
    atom_p = jnp.pad(atom_in_fea, ((0, S_pad - N), (0, A_pad - A)))
    s2_p = jnp.pad(s2, (0, A_pad - A)).reshape(1, A_pad)
    t2_p = jnp.pad(t2, (0, A_pad - A)).reshape(1, A_pad)

    pool_cost = pl.CostEstimate(
        flops=2 * E_pad * A_pad * min(S_pad, 2 * ts),
        transcendentals=S_pad * A_pad,
        bytes_accessed=2 * E_pad * A_pad * dt_sz + E_pad * 4 + 2 * S_pad * A_pad * 4)

    def edge_blk(s, e, fe, le):
        # clamp the visited edge-tile index into this segment tile's range so
        # skipped grid steps re-use the previous block (DMA elided).
        lo = fe[s]
        hi = jnp.maximum(le[s], lo)
        return jnp.minimum(jnp.maximum(e, lo), hi)

    out_p = pl.pallas_call(
        pool_kernel,
        out_shape=jax.ShapeDtypeStruct((S_pad, A_pad), out_dtype),
        grid_spec=pltpu.PrefetchScalarGridSpec(
            num_scalar_prefetch=2,
            grid=(n_s, n_ep),                          # reduction (edge) axis last
            in_specs=[
                pl.BlockSpec((1, pool_edge_tile),
                             lambda s, e, fe, le: (0, edge_blk(s, e, fe, le))),
                _buffered_spec((pool_edge_tile, A_pad),
                               lambda s, e, fe, le: (edge_blk(s, e, fe, le), 0)),
                pl.BlockSpec((ts, A_pad), lambda s, e, fe, le: (s, 0)),
                pl.BlockSpec((1, A_pad), lambda s, e, fe, le: (0, 0)),
                pl.BlockSpec((1, A_pad), lambda s, e, fe, le: (0, 0)),
            ],
            out_specs=pl.BlockSpec((ts, A_pad), lambda s, e, fe, le: (s, 0)),
            scratch_shapes=[pltpu.VMEM((ts, A_pad), jnp.float32)],
        ),
        compiler_params=pltpu.CompilerParams(
            dimension_semantics=("parallel", "arbitrary"),
            vmem_limit_bytes=vmem_limit),
        cost_estimate=pool_cost,
    )(first_e, last_e, idx_p, nbr_msg, atom_p, s2_p, t2_p)

    return out_p[:N, :A]


if __name__ == "__main__":
    key = jax.random.PRNGKey(0)
    ks = jax.random.split(key, 12)

    A, B = 64, 32          # atom_fea_len, nbr_fea_len
    N, M = 32, 12          # atoms, neighbors per atom
    E = N * M              # 384 flattened edges
    eps = 1e-5

    atom_in = jax.random.normal(ks[0], (N, A), dtype=jnp.float32)
    nbr_fea = jax.random.normal(ks[1], (E, B), dtype=jnp.float32)
    self_idx = jnp.repeat(jnp.arange(N, dtype=jnp.int32), M)            # (E,) sorted
    nbr_idx = jax.random.randint(ks[2], (E,), 0, N, dtype=jnp.int32)    # (E,)

    Din = 2 * A + B
    W = 0.1 * jax.random.normal(ks[3], (2 * A, Din), dtype=jnp.float32)
    b = 0.1 * jax.random.normal(ks[4], (2 * A,), dtype=jnp.float32)
    g1 = 1.0 + 0.1 * jax.random.normal(ks[5], (2 * A,), dtype=jnp.float32)
    b1 = 0.1 * jax.random.normal(ks[6], (2 * A,), dtype=jnp.float32)
    m1 = 0.1 * jax.random.normal(ks[7], (2 * A,), dtype=jnp.float32)
    v1 = 0.5 + jnp.abs(jax.random.normal(ks[8], (2 * A,), dtype=jnp.float32))
    g2 = 1.0 + 0.1 * jax.random.normal(ks[9], (A,), dtype=jnp.float32)
    b2 = 0.1 * jax.random.normal(ks[10], (A,), dtype=jnp.float32)
    m2 = 0.1 * jax.random.normal(ks[11], (A,), dtype=jnp.float32)
    v2 = 0.5 + jnp.abs(jax.random.normal(ks[0], (A,), dtype=jnp.float32))

    params = dict(W=W, b=b, bn1=(g1, b1, m1, v1), bn2=(g2, b2, m2, v2), eps=eps)

    # fast path: bf16 MXU operands, f32 accumulation
    out_bf16 = conv_layer_forward(atom_in, nbr_fea, self_idx, nbr_idx, params)
    out_bf16 = jax.block_until_ready(out_bf16)

    # f32 path: tight structural check of gather/matmul/gate/scatter/bn fusion
    out_f32 = conv_layer_forward(atom_in, nbr_fea, self_idx, nbr_idx, params,
                                 compute_dtype=jnp.float32)
    out_f32 = jax.block_until_ready(out_f32)

    # ---- pure-JAX module reference (eval-mode batch norm, f32) ----------------
    atom_self = atom_in[self_idx]
    atom_nbr = atom_in[nbr_idx]
    total = jnp.concatenate([atom_self, atom_nbr, nbr_fea], axis=1)
    z = jnp.dot(total, W.T, precision=jax.lax.Precision.HIGHEST) + b
    z = (z - m1) / jnp.sqrt(v1 + eps) * g1 + b1
    msg = jax.nn.sigmoid(z[:, :A]) * jax.nn.softplus(z[:, A:])
    pooled = jax.ops.segment_sum(msg, self_idx, num_segments=N)
    bn = (pooled - m2) / jnp.sqrt(v2 + eps) * g2 + b2
    ref_f32 = jax.nn.softplus(atom_in + bn)

    # ---- bf16-faithful reference (same folded params / operand dtypes) --------
    W1, W2, W3, shift = _fold_bn1(params, A, eps)
    s2, t2 = _fold_bn2(params, eps)
    cdt = jnp.bfloat16
    zb = (jnp.dot(atom_self.astype(cdt), W1.astype(cdt), preferred_element_type=jnp.float32)
          + jnp.dot(atom_nbr.astype(cdt), W2.astype(cdt), preferred_element_type=jnp.float32)
          + jnp.dot(nbr_fea.astype(cdt), W3.astype(cdt), preferred_element_type=jnp.float32)
          + shift)
    msg_b = (_sigmoid(zb[:, :A]) * _softplus(zb[:, A:])).astype(cdt).astype(jnp.float32)
    pooled_b = jax.ops.segment_sum(msg_b, self_idx, num_segments=N)
    ref_bf16 = _softplus(atom_in + pooled_b * s2 + t2)

    assert out_bf16.shape == (N, A) and out_f32.shape == (N, A)
    err_f32 = float(jnp.max(jnp.abs(out_f32 - ref_f32)))
    err_bf16 = float(jnp.max(jnp.abs(out_bf16 - ref_bf16)))
    err_mix = float(jnp.max(jnp.abs(out_bf16 - ref_f32)))
    assert jnp.allclose(out_f32, ref_f32, atol=2e-3, rtol=2e-3), err_f32
    assert jnp.allclose(out_bf16, ref_bf16, atol=5e-3, rtol=5e-3), err_bf16
    assert jnp.allclose(out_bf16, ref_f32, atol=3e-1, rtol=1e-1), err_mix

    print("KERNEL_OK")
</pallas_src>

<mosaic_0001>
module attributes {stable_mosaic.version = 11 : i64} {
  func.func @edge_kernel(%arg0: i32, %arg1: memref<256x64xbf16, #tpu.memory_space<vmem>>, %arg2: memref<256x64xbf16, #tpu.memory_space<vmem>>, %arg3: memref<256x32xbf16, #tpu.memory_space<vmem>>, %arg4: memref<64x256xbf16, #tpu.memory_space<vmem>>, %arg5: memref<64x256xbf16, #tpu.memory_space<vmem>>, %arg6: memref<32x256xbf16, #tpu.memory_space<vmem>>, %arg7: memref<1x256xf32, #tpu.memory_space<vmem>>, %arg8: memref<256x128xbf16, #tpu.memory_space<vmem>>) attributes {dimension_semantics = [#tpu.dimension_semantics<parallel>], iteration_bounds = array<i64: 2>, scalar_prefetch = 0 : i64, scratch_operands = 0 : i64, tpu.core_type = #tpu.core_type<tc>, window_params = [{transform_indices = @transform_0, window_bounds = array<i64: 256, 64>}, {transform_indices = @transform_1, window_bounds = array<i64: 256, 64>}, {transform_indices = @transform_2, window_bounds = array<i64: 256, 32>}, {pipeline_mode = #tpu.pipeline_mode<synchronous>, transform_indices = @transform_3, window_bounds = array<i64: 64, 256>}, {pipeline_mode = #tpu.pipeline_mode<synchronous>, transform_indices = @transform_4, window_bounds = array<i64: 64, 256>}, {pipeline_mode = #tpu.pipeline_mode<synchronous>, transform_indices = @transform_5, window_bounds = array<i64: 32, 256>}, {pipeline_mode = #tpu.pipeline_mode<synchronous>, transform_indices = @transform_6, window_bounds = array<i64: 1, 256>}, {transform_indices = @transform_7, window_bounds = array<i64: 256, 128>}]} {
    %c0 = arith.constant 0 : index
    %c0_0 = arith.constant 0 : index
    %0 = vector.load %arg1[%c0, %c0_0] : memref<256x64xbf16, #tpu.memory_space<vmem>>, vector<256x64xbf16>
    %c0_1 = arith.constant 0 : index
    %c0_2 = arith.constant 0 : index
    %1 = vector.load %arg4[%c0_1, %c0_2] : memref<64x256xbf16, #tpu.memory_space<vmem>>, vector<64x256xbf16>
    %cst = arith.constant dense<0.000000e+00> : vector<256x256xf32>
    %2 = tpu.matmul %0, %1, %cst {dimension_numbers = #tpu.dot_dimension_numbers<[1], [0], [0], [1], [0, 0, 1, 1], [], []>} : vector<256x64xbf16>, vector<64x256xbf16>, vector<256x256xf32> -> vector<256x256xf32>
    %c0_3 = arith.constant 0 : index
    %c0_4 = arith.constant 0 : index
    %3 = vector.load %arg2[%c0_3, %c0_4] : memref<256x64xbf16, #tpu.memory_space<vmem>>, vector<256x64xbf16>
    %c0_5 = arith.constant 0 : index
    %c0_6 = arith.constant 0 : index
    %4 = vector.load %arg5[%c0_5, %c0_6] : memref<64x256xbf16, #tpu.memory_space<vmem>>, vector<64x256xbf16>
    %cst_7 = arith.constant dense<0.000000e+00> : vector<256x256xf32>
    %5 = tpu.matmul %3, %4, %cst_7 {dimension_numbers = #tpu.dot_dimension_numbers<[1], [0], [0], [1], [0, 0, 1, 1], [], []>} : vector<256x64xbf16>, vector<64x256xbf16>, vector<256x256xf32> -> vector<256x256xf32>
    %6 = arith.addf %2, %5 : vector<256x256xf32>
    %c0_8 = arith.constant 0 : index
    %c0_9 = arith.constant 0 : index
    %7 = vector.load %arg3[%c0_8, %c0_9] : memref<256x32xbf16, #tpu.memory_space<vmem>>, vector<256x32xbf16>
    %c0_10 = arith.constant 0 : index
    %c0_11 = arith.constant 0 : index
    %8 = vector.load %arg6[%c0_10, %c0_11] : memref<32x256xbf16, #tpu.memory_space<vmem>>, vector<32x256xbf16>
    %cst_12 = arith.constant dense<0.000000e+00> : vector<256x256xf32>
    %9 = tpu.matmul %7, %8, %cst_12 {dimension_numbers = #tpu.dot_dimension_numbers<[1], [0], [0], [1], [0, 0, 1, 1], [], []>} : vector<256x32xbf16>, vector<32x256xbf16>, vector<256x256xf32> -> vector<256x256xf32>
    %10 = arith.addf %6, %9 : vector<256x256xf32>
    %c0_13 = arith.constant 0 : index
    %c0_14 = arith.constant 0 : index
    %11 = vector.load %arg7[%c0_13, %c0_14] : memref<1x256xf32, #tpu.memory_space<vmem>>, vector<1x256xf32>
    %12 = vector.broadcast %11 : vector<1x256xf32> to vector<256x256xf32>
    %13 = arith.addf %10, %12 : vector<256x256xf32>
    %14 = vector.extract_strided_slice %13 {offsets = [0, 0], sizes = [256, 128], strides = [1, 1]} : vector<256x256xf32> to vector<256x128xf32>
    %cst_15 = arith.constant 5.000000e-01 : f32
    %15 = vector.broadcast %cst_15 : f32 to vector<256x128xf32>
    %16 = arith.mulf %15, %14 : vector<256x128xf32>
    %17 = math.tanh %16 : vector<256x128xf32>
    %cst_16 = arith.constant 5.000000e-01 : f32
    %18 = vector.broadcast %cst_16 : f32 to vector<256x128xf32>
    %19 = arith.mulf %18, %17 : vector<256x128xf32>
    %cst_17 = arith.constant 5.000000e-01 : f32
    %20 = vector.broadcast %cst_17 : f32 to vector<256x128xf32>
    %21 = arith.addf %19, %20 : vector<256x128xf32>
    %22 = vector.extract_strided_slice %13 {offsets = [0, 128], sizes = [256, 128], strides = [1, 1]} : vector<256x256xf32> to vector<256x128xf32>
    %cst_18 = arith.constant 0.000000e+00 : f32
    %23 = vector.broadcast %cst_18 : f32 to vector<256x128xf32>
    %24 = arith.maximumf %22, %23 : vector<256x128xf32>
    %25 = math.absf %22 : vector<256x128xf32>
    %cst_19 = arith.constant 0.000000e+00 : f32
    %26 = vector.broadcast %cst_19 : f32 to vector<256x128xf32>
    %27 = arith.subf %26, %25 : vector<256x128xf32>
    %28 = math.exp %27 : vector<256x128xf32>
    %29 = math.log1p %28 : vector<256x128xf32>
    %30 = arith.addf %24, %29 : vector<256x128xf32>
    %31 = arith.mulf %21, %30 : vector<256x128xf32>
    %32 = arith.truncf %31 : vector<256x128xf32> to vector<256x128xbf16>
    %c0_20 = arith.constant 0 : index
    %c0_21 = arith.constant 0 : index
    %33 = vector.load %arg8[%c0_20, %c0_21] : memref<256x128xbf16, #tpu.memory_space<vmem>>, vector<256x128xbf16>
    tpu.vector_store %arg8[%c0_20, %c0_21], %32 {strides = array<i32>} : memref<256x128xbf16, #tpu.memory_space<vmem>>, vector<256x128xbf16>,
    return
  }
  func.func @transform_0(%arg0: i32) -> (i32, i32) {
    %c0_i32 = arith.constant 0 : i32
    %c0_i32_0 = arith.constant 0 : i32
    return %arg0, %c0_i32 : i32, i32
  }
  func.func @transform_1(%arg0: i32) -> (i32, i32) {
    %c0_i32 = arith.constant 0 : i32
    %c0_i32_0 = arith.constant 0 : i32
    return %arg0, %c0_i32 : i32, i32
  }
  func.func @transform_2(%arg0: i32) -> (i32, i32) {
    %c0_i32 = arith.constant 0 : i32
    %c0_i32_0 = arith.constant 0 : i32
    return %arg0, %c0_i32 : i32, i32
  }
  func.func @transform_3(%arg0: i32) -> (i32, i32) {
    %c0_i32 = arith.constant 0 : i32
    %c0_i32_0 = arith.constant 0 : i32
    %c0_i32_1 = arith.constant 0 : i32
    return %c0_i32, %c0_i32_0 : i32, i32
  }
  func.func @transform_4(%arg0: i32) -> (i32, i32) {
    %c0_i32 = arith.constant 0 : i32
    %c0_i32_0 = arith.constant 0 : i32
    %c0_i32_1 = arith.constant 0 : i32
    return %c0_i32, %c0_i32_0 : i32, i32
  }
  func.func @transform_5(%arg0: i32) -> (i32, i32) {
    %c0_i32 = arith.constant 0 : i32
    %c0_i32_0 = arith.constant 0 : i32
    %c0_i32_1 = arith.constant 0 : i32
    return %c0_i32, %c0_i32_0 : i32, i32
  }
  func.func @transform_6(%arg0: i32) -> (i32, i32) {
    %c0_i32 = arith.constant 0 : i32
    %c0_i32_0 = arith.constant 0 : i32
    %c0_i32_1 = arith.constant 0 : i32
    return %c0_i32, %c0_i32_0 : i32, i32
  }
  func.func @transform_7(%arg0: i32) -> (i32, i32) {
    %c0_i32 = arith.constant 0 : i32
    %c0_i32_0 = arith.constant 0 : i32
    return %arg0, %c0_i32 : i32, i32
  }
}

</mosaic_0001>

<bundles_post_ra>
// kernel: tpu_custom_call.1
= control target key start
LH: loop header
LB: loop body
LE: loop exit
PB: predicated region body
PF: predicated region fallthrough
CT: control target
= control target key end

     0   :  { %12 = vsyncpa [#allocation3], 0  ;;  %s4563_s0 = inlined_call_operand.vmem [shape: bf16[512,64], index: 0, kind: input, shape index: {}]   ;;  %s4564_s1 = inlined_call_operand.vmem [shape: bf16[512,64], index: 1, kind: input, shape index: {}]   ;;  %s4565_s2 = inlined_call_operand.vmem [shape: bf16[512,32], index: 2, kind: input, shape index: {}]   ;;  %s4566_s3 = inlined_call_operand.vmem [shape: bf16[64,256], index: 3, kind: input, shape index: {}]   ;;  %s4567_s4 = inlined_call_operand.vmem [shape: bf16[64,256], index: 4, kind: input, shape index: {}]   ;;  %s4568_s5 = inlined_call_operand.vmem [shape: bf16[32,256], index: 5, kind: input, shape index: {}]   ;;  %s4569_s6 = inlined_call_operand.vmem [shape: f32[1,256], index: 6, kind: input, shape index: {}]   ;;  %s4570_s7 = inlined_call_operand.hbm [shape: bf16[512,128], index: 7, kind: output, shape index: {}]  }
   0x1   :  { %14 = vsyncpa [#allocation3 + $0x1], 0  ;;  %s3394_s24 = smov 0   ;;  %s3396_s25 = smov 0  }
   0x2   :  { %s3398_s26 = smov 0   ;;  %s3400_s27 = smov 0  }
   0x3 LB: > { %s3415_s28 = sadd.s32 4294967295, %s3348_s27   ;;  %s2546_s29 = sadd.s32 4294967294, %s3348_s27   ;;  %s3348_s27 = sphi %s3400_s27, %s4621_s27   ;;  %s3344_s26 = sphi %s3398_s26, %s4620_s26   ;;  %s3340_s25 = sphi %s3396_s25, %s4619_s25   ;;  %s3336_s24 = sphi %s3394_s24, %s4618_s24  }
   0x4   : > { %s3419_s30 = sadd.s32 1, %s3348_s27   ;;  %s189_s8 = sadd.s32 1, %s3344_s26 }
   0x5   : > { %s186_s9 = ssub.s32 %s3348_s27, %s3419_s30  ;;  %p199_p0 = scmp.ne.s32.totalorder %s3344_s26, %s3340_s25 }
   0x6   : > { %p187_p1 = scmp.eq.s32.totalorder %s186_s9, 0  ;;  %p200_p2 = scmp.eq.s32.totalorder %s3415_s28, 1 }
   0x7   : > { %p205_p3 = scmp.ne.s32.totalorder %s3340_s25, %s3336_s24  ;;  %p206_p4 = scmp.eq.s32.totalorder %s2546_s29, 1 }
   0x8   : > { %s3430_s10 = scalar_select %p187_p1, %s3344_s26, %s189_s8  }
   0x9   : > { %p3432_p5 = por %p200_p2, %p199_p0  ;;  %p3436_p6 = por %p206_p4, %p205_p3 }
   0xa   : > { %p2549_p7 = scmp.ge.s32.totalorder %s3348_s27, 1  ;;  %p263_p8 = scmp.lt.s32.totalorder %s3348_s27, 3 }
   0xc   : > { %p264_p9 = pnand %p2549_p7, %p263_p8 }
   0xe   : > { %267 = sbr.rel (%p264_p9) target bundleno = 556 (0x22c), region = 48 }
  0x15   : > { %v3016_v0 = vld [vmem:[%s4567_s4 + $0x4] ss:$8 sps:$4 sm:$0xff]   ;;  %s2551_s15 = sshll.u32 %s3415_s28, 5  ;;  %v3350_v2 = vmov 0   ;;  %v3020_v3 = vld [vmem:[%s4567_s4] ss:$8 sps:$4 sm:$0xff]  }
  0x16   : > { %v3018_v1 = vld [vmem:[%s4566_s3 + $0x4] ss:$8 sps:$4 sm:$0xff]   ;;  %606 = vmatprep.mubr.bf16.mxu1 %v3350_v2  ;;  %967 = vmatprep.mubr.bf16.mxu0 %v3350_v2  ;;  %p306_p10 = scmp.lt.s32.totalorder %s2551_s15, 63  ;;  %v3021_v4 = vld [vmem:[%s4566_s3] ss:$8 sps:$4 sm:$0xff]   ;;  %vm525_vm0 = vcmask 523264  }
  0x17   : > { %574 = vmatprep.subr.bf16.mxu1 %v3016_v0  ;;  %935 = vmatprep.subr.bf16.mxu0 %v3018_v1  ;;  %v3022_v5 = vld [vmem:[%s4567_s4 + $0x14] ss:$8 sps:$4 sm:$0xff]   ;;  %v3026_v7 = vld [vmem:[%s4567_s4 + $0x10] ss:$8 sps:$4 sm:$0xff]   ;;  %v3028_v9 = vld [vmem:[%s4567_s4 + $0x24] ss:$8 sps:$4 sm:$0xff]  }
  0x18   : > { %s4623_s15 = smov (!%p306_p10, %s2551_s15), 63  ;;  %575 = vmatpush1.bf16.msra.mxu1 %v3020_v3  ;;  %936 = vmatpush1.bf16.msra.mxu0 %v3021_v4  ;;  %v3024_v6 = vld [vmem:[%s4566_s3 + $0x14] ss:$8 sps:$4 sm:$0xff]   ;;  %v3027_v8 = vld [vmem:[%s4566_s3 + $0x10] ss:$8 sps:$4 sm:$0xff]   ;;  %vm1264_vm1 = vcmask 261120  }
  0x19   : > { %576 = vmatprep.subr.bf16.mxu1 %v3022_v5  ;;  %937 = vmatprep.subr.bf16.mxu0 %v3024_v6  ;;  %s3472_s19 = sshll.u32 %s4623_s15, 2  ;;  %v3030_v10 = vld [vmem:[%s4566_s3 + $0x24] ss:$8 sps:$4 sm:$0xff]   ;;  %v3032_v11 = vld [vmem:[%s4567_s4 + $0x20] ss:$8 sps:$4 sm:$0xff]   ;;  %s2742_s14 = sshll.u32 %s3415_s28, 11 }
  0x1a   : > { %v3033_v12 = vld [vmem:[%s4566_s3 + $0x20] ss:$8 sps:$4 sm:$0xff]   ;;  %v3034_v13 = vld [vmem:[%s4567_s4 + $0x34] ss:$8 sps:$4 sm:$0xff]   ;;  %s3493_s18 = scalar_lea.vmem %s4564_s1, %s3472_s19  ;;  %s3499_s22 = scalar_lea.vmem %s4563_s0, %s3472_s19  ;;  %v3038_v15 = vld [vmem:[%s4567_s4 + $0x30] ss:$8 sps:$4 sm:$0xff]  }
  0x1b   : > { %v3036_v14 = vld [vmem:[%s4566_s3 + $0x34] ss:$8 sps:$4 sm:$0xff]   ;;  %v3039_v16 = vld [vmem:[%s4566_s3 + $0x30] ss:$8 sps:$4 sm:$0xff]   ;;  %v3044_v17 = vld [vmem:[%s4568_s5 + $0x4] ss:$8 sps:$4 sm:$0xff]   ;;  %s3535_s9 = scalar_lea.vmem %s4565_s2, %s3472_s19  ;;  %s4515_s21 = scalar_lea.hbm %s4570_s7, %s2742_s14 }
  0x1c   : > { %577 = vmatpush1.bf16.msra.mxu1 %v3026_v7  ;;  %938 = vmatpush1.bf16.msra.mxu0 %v3027_v8  ;;  %v3040_v18 = vld [vmem:[%s3493_s18] sm:$0xff]   ;;  %v3045_v21 = vld [vmem:[%s3493_s18 + $0x8] sm:$0xff]   ;;  %v3053_v23 = vld [vmem:[%s4568_s5 + $0x10] ss:$8 sps:$4 sm:$0xff]   ;;  %s3351_s28 = smov [#allocation2]  }
  0x1d   : > { %578 = vmatprep.subr.bf16.mxu1 %v3028_v9  ;;  %939 = vmatprep.subr.bf16.mxu0 %v3030_v10  ;;  %v3041_v19 = vld [vmem:[%s3499_s22] sm:$0xff]   ;;  %v3046_v22 = vld [vmem:[%s3499_s22 + $0x8] sm:$0xff]   ;;  %v3055_v24 = vld [vmem:[%s4568_s5 + $0x14] ss:$8 sps:$4 sm:$0xff]   ;;  %s3290_s8 = sshll.u32 %s3351_s28, 4  ;;  %s3291_s8 = int_to_ptr.vmem [resolvable:$false] %s3290_s8 }
  0x1e   : > { %v3042_v20 = vld [vmem:[%s4568_s5] ss:$8 sps:$4 sm:$0xff]   ;;  %v3047_v25 = vld [vmem:[%s3493_s18 + $0x10] sm:$0xff]   ;;  %v3049_v27 = vld [vmem:[%s3493_s18 + $0x18] sm:$0xff]  }
  0x1f   : > { %v3048_v26 = vld [vmem:[%s3499_s22 + $0x10] sm:$0xff]   ;;  %v3050_v28 = vld [vmem:[%s3499_s22 + $0x18] sm:$0xff]   ;;  %v3051_v29 = vld [vmem:[%s3493_s18 + $0x20] sm:$0xff]  }
  0x20   : > { %579 = vmatpush1.bf16.msra.mxu1 %v3032_v11  ;;  %940 = vmatpush1.bf16.msra.mxu0 %v3033_v12  ;;  %v3052_v30 = vld [vmem:[%s3499_s22 + $0x20] sm:$0xff]   ;;  %v3056_v31 = vld [vmem:[%s3493_s18 + $0x28] sm:$0xff]   ;;  %v3058_v33 = vld [vmem:[%s3493_s18 + $0x30] sm:$0xff]  }
  0x21   : > { %580 = vmatprep.subr.bf16.mxu1 %v3034_v13  ;;  %941 = vmatprep.subr.bf16.mxu0 %v3036_v14  ;;  %v3057_v32 = vld [vmem:[%s3499_s22 + $0x28] sm:$0xff]   ;;  %v3059_v34 = vld [vmem:[%s3499_s22 + $0x30] sm:$0xff]   ;;  %v3060_v35 = vld [vmem:[%s3493_s18 + $0x38] sm:$0xff]  }
  0x22   : > { %v3061_v36 = vld [vmem:[%s3499_s22 + $0x38] sm:$0xff]   ;;  %v3062_v37 = vld [vmem:[%s3493_s18 + $0x40] sm:$0xff]   ;;  %v3064_v39 = vld [vmem:[%s3493_s18 + $0x48] sm:$0xff]  }
  0x23   : > { %v3063_v38 = vld [vmem:[%s3535_s9] sm:$0xff]   ;;  %v3065_v40 = vld [vmem:[%s3535_s9 + $0x8] sm:$0xff]   ;;  %v3066_v41 = vld [vmem:[%s3493_s18 + $0x50] sm:$0xff]  }
  0x24   : > { %581 = vmatpush1.bf16.msra.mxu1 %v3038_v15  ;;  %942 = vmatpush1.bf16.msra.mxu0 %v3039_v16  ;;  %v3067_v42 = vld [vmem:[%s3535_s9 + $0x10] sm:$0xff]   ;;  %v3068_v43 = vld [vmem:[%s3493_s18 + $0x58] sm:$0xff]   ;;  %v3070_v45 = vld [vmem:[%s3493_s18 + $0x60] sm:$0xff]  }
  0x25   : > { %2838 = vmatprep.subr.bf16.mxu1 %v3018_v1  ;;  %1313 = vmatprep.subr.bf16.mxu0 %v3044_v17  ;;  %v3069_v44 = vld [vmem:[%s3535_s9 + $0x18] sm:$0xff]   ;;  %v3071_v46 = vld [vmem:[%s3535_s9 + $0x20] sm:$0xff]   ;;  %v3072_v47 = vld [vmem:[%s3493_s18 + $0x68] sm:$0xff]  }
  0x26   : > { %v3073_v48 = vld [vmem:[%s3535_s9 + $0x28] sm:$0xff]   ;;  %v3074_v49 = vld [vmem:[%s3493_s18 + $0x70] sm:$0xff]   ;;  %v3076_v51 = vld [vmem:[%s3493_s18 + $0x78] sm:$0xff]  }
  0x27   : > { %2581 = vmatmul.mubr.msk.bf16.vlgmr.msra.gmra.mrb[0].mxu1 %vm525_vm0, %v3040_v18  ;;  %2621 = vmatmul.mubr.msk.bf16.vlgmr.msra.gmra.mrb[0].mxu0 %vm525_vm0, %v3041_v19  ;;  %v3075_v50 = vld [vmem:[%s3535_s9 + $0x30] sm:$0xff]   ;;  %v3077_v52 = vld [vmem:[%s3535_s9 + $0x38] sm:$0xff]   ;;  %v3078_v53 = vld [vmem:[%s3499_s22 + $0x40] sm:$0xff]  }
  0x28   : > { %2842 = vmatpush1.bf16.msra.mxu1 %v3021_v4  ;;  %1314 = vmatpush1.bf16.msra.mxu0 %v3042_v20  ;;  %v3079_v54 = vld [vmem:[%s3535_s9 + $0x40] sm:$0xff]   ;;  %v3080_v55 = vld [vmem:[%s3499_s22 + $0x48] sm:$0xff]   ;;  %v3082_v57 = vld [vmem:[%s3499_s22 + $0x50] sm:$0xff]  }
  0x29   : > { %616 = vmatprep.mubr.bf16.mxu1 %v3350_v2  ;;  %977 = vmatprep.mubr.bf16.mxu0 %v3350_v2  ;;  %v3081_v56 = vld [vmem:[%s3535_s9 + $0x48] sm:$0xff]   ;;  %v3083_v58 = vld [vmem:[%s3535_s9 + $0x50] sm:$0xff]   ;;  %v3084_v59 = vld [vmem:[%s3499_s22 + $0x58] sm:$0xff]  }
  0x2a   : > { %2839 = vmatprep.subr.bf16.mxu1 %v3024_v6  ;;  %1315 = vmatprep.subr.bf16.mxu0 %v3055_v24  ;;  %v3085_v60 = vld [vmem:[%s3535_s9 + $0x58] sm:$0xff]   ;;  %v3086_v61 = vld [vmem:[%s3499_s22 + $0x60] sm:$0xff]   ;;  %v3088_v63 = vld [vmem:[%s3499_s22 + $0x68] sm:$0xff]  }
  0x2b   : > { %v3087_v62 = vld [vmem:[%s3535_s9 + $0x60] sm:$0xff]   ;;  %v3089_v0 = vld [vmem:[%s3535_s9 + $0x68] sm:$0xff]   ;;  %v3090_v1 = vld [vmem:[%s3499_s22 + $0x70] sm:$0xff]  }
  0x2c   : > { %2843 = vmatpush1.bf16.msra.mxu1 %v3027_v8  ;;  %1316 = vmatpush1.bf16.msra.mxu0 %v3053_v23  ;;  %v3091_v3 = vld [vmem:[%s3535_s9 + $0x70] sm:$0xff]   ;;  %v3092_v4 = vld [vmem:[%s3499_s22 + $0x78] sm:$0xff]   ;;  %s302_s22 = sand.u32 1, %s3340_s25  }
  0x2d   : > { %2840 = vmatprep.subr.bf16.mxu1 %v3030_v10  ;;  %v3093_v5 = vld [vmem:[%s3535_s9 + $0x78] sm:$0xff]   ;;  %s3825_s13 = sshll.u32 %s302_s22, 7  ;;  %s4522_s23 = scalar_lea.sflag [#allocation3], %s302_s22 }
  0x2e   : > { %s3847_s15 = scalar_lea.vmem [#allocation2], %s3825_s13  ;;  %s3292_s9 = scalar_lea.vmem %s3291_s8, 4096 }
  0x2f   : > { %2582 = vmatmul.mubr.msk.bf16.gmra.mrb[4].mxu1 %vm525_vm0, %v3045_v21  ;;  %2622 = vmatmul.mubr.msk.bf16.gmra.mrb[4].mxu0 %vm525_vm0, %v3046_v22  ;;  %s2460_s16 = sshll.u32 %s3847_s15, 4  ;;  %s4517_s16 = int_to_ptr.vmem [resolvable:$true] %s2460_s16 }
  0x30   : > { %626 = vmatprep.mubr.bf16.mxu1 %v3350_v2  ;;  %987 = vmatprep.mubr.bf16.mxu0 %v3350_v2  ;;  %s3286_s29 = scalar_lea.vmem %s4517_s16, 2048  ;;  %p3293_p0 = scmp.lt.s32.totalorder %s4517_s16, %s3291_s8 }
  0x31   : > { %2844 = vmatpush1.bf16.msra.mxu1 %v3033_v12  ;;  %p3287_p11 = scmp.ne.s32.totalorder %s4517_s16, %s3286_s29  ;;  %p3294_p1 = scmp.lt.s32.totalorder %s3292_s9, %s3286_s29 }
  0x32   : > { %2841 = vmatprep.subr.bf16.mxu1 %v3036_v14 }
  0x33   : > { %p3288_p12 = pnand %p3287_p11, %p3432_p5  ;;  %p3295_p2 = por %p3294_p1, %p3293_p0 }
  0x35   : > { %2845 = vmatpush1.bf16.msra.mxu1 %v3039_v16  ;;  %p3289_p13 = pneg %p3288_p12 }
  0x37   : > { %2583 = vmatmul.mubr.msk.bf16.gmra.mrb[8].mxu1 %vm525_vm0, %v3047_v25  ;;  %2623 = vmatmul.mubr.msk.bf16.gmra.mrb[8].mxu0 %vm525_vm0, %v3048_v26  ;;  %p3296_p3 = pnand %p3295_p2, %p3289_p13 }
  0x38   : > { %636 = vmatprep.mubr.bf16.mxu1 %v3350_v2  ;;  %997 = vmatprep.mubr.bf16.mxu0 %v3350_v2 }
  0x3f   : > { %2584 = vmatmul.mubr.msk.bf16.gmra.mrb[12].mxu1 %vm525_vm0, %v3049_v27  ;;  %2624 = vmatmul.mubr.msk.bf16.gmra.mrb[12].mxu0 %vm525_vm0, %v3050_v28 }
  0x40   : > { %646 = vmatprep.mubr.bf16.mxu1 %v3350_v2  ;;  %1007 = vmatprep.mubr.bf16.mxu0 %v3350_v2 }
  0x47   : > { %2585 = vmatmul.mubr.msk.bf16.gmra.mrb[16].mxu1 %vm525_vm0, %v3051_v29  ;;  %2625 = vmatmul.mubr.msk.bf16.gmra.mrb[16].mxu0 %vm525_vm0, %v3052_v30 }
  0x48   : > { %656 = vmatprep.mubr.bf16.mxu1 %v3350_v2  ;;  %1017 = vmatprep.mubr.bf16.mxu0 %v3350_v2 }
  0x4f   : > { %2586 = vmatmul.mubr.msk.bf16.gmra.mrb[20].mxu1 %vm525_vm0, %v3056_v31  ;;  %2626 = vmatmul.mubr.msk.bf16.gmra.mrb[20].mxu0 %vm525_vm0, %v3057_v32 }
  0x50   : > { %666 = vmatprep.mubr.bf16.mxu1 %v3350_v2  ;;  %1027 = vmatprep.mubr.bf16.mxu0 %v3350_v2 }
  0x57   : > { %2587 = vmatmul.mubr.msk.bf16.gmra.mrb[24].mxu1 %vm525_vm0, %v3058_v33  ;;  %2627 = vmatmul.mubr.msk.bf16.gmra.mrb[24].mxu0 %vm525_vm0, %v3059_v34  ;;  %v1572_v33 = vlaneseq }
  0x58   : > { %676 = vmatprep.mubr.bf16.mxu1 %v3350_v2  ;;  %1037 = vmatprep.mubr.bf16.mxu0 %v3350_v2 }
  0x59   : > { %v1573_v34 = vshrl.u32 %v1572_v33, 7 }
  0x5f   : > { %2588 = vmatmul.mubr.msk.bf16.gmra.mrb[28].mxu1 %vm525_vm0, %v3060_v35  ;;  %2628 = vmatmul.mubr.msk.bf16.gmra.mrb[28].mxu0 %vm525_vm0, %v3061_v36 }
  0x60   : > { %686 = vmatprep.mubr.bf16.mxu1 %v3350_v2  ;;  %1345 = vmatprep.mubr.bf16.mxu0 %v3350_v2 }
  0x67   : > { %2589 = vmatmul.mubr.msk.bf16.gmra.mrb[32].mxu1 %vm525_vm0, %v3062_v37  ;;  %2657 = vmatmul.mubr.msk.bf16.vlgmr.msra.gmra.mrb[0].mxu0 %vm1264_vm1, %v3063_v38 }
  0x68   : > { %696 = vmatprep.mubr.bf16.mxu1 %v3350_v2  ;;  %1355 = vmatprep.mubr.bf16.mxu0 %v3350_v2 }
  0x6f   : > { %2590 = vmatmul.mubr.msk.bf16.gmra.mrb[36].mxu1 %vm525_vm0, %v3064_v39  ;;  %2658 = vmatmul.mubr.msk.bf16.gmra.mrb[4].mxu0 %vm1264_vm1, %v3065_v40  ;;  %v1574_v39 = vsub.s32 0, %v1573_v34  ;;  %v1570_v40 = vld [vmem:[%s4569_s6] sm:$0x3] }
  0x70   : > { %706 = vmatprep.mubr.bf16.mxu1 %v3350_v2  ;;  %1365 = vmatprep.mubr.bf16.mxu0 %v3350_v2 }
  0x77   : > { %2591 = vmatmul.mubr.msk.bf16.gmra.mrb[40].mxu1 %vm525_vm0, %v3066_v41  ;;  %2659 = vmatmul.mubr.msk.bf16.gmra.mrb[8].mxu0 %vm1264_vm1, %v3067_v42  ;;  %v1578_v41 = vsub.s32 1, %v1573_v34  ;;  %v3720_v42 = vrot.slane %v1570_v40, %v1574_v39 }
  0x78   : > { %716 = vmatprep.mubr.bf16.mxu1 %v3350_v2  ;;  %1375 = vmatprep.mubr.bf16.mxu0 %v3350_v2 }
  0x7f   : > { %2592 = vmatmul.mubr.msk.bf16.gmra.mrb[44].mxu1 %vm525_vm0, %v3068_v43  ;;  %2660 = vmatmul.mubr.msk.bf16.gmra.mrb[12].mxu0 %vm1264_vm1, %v3069_v44  ;;  %v3722_v44 = vrot.slane %v1570_v40, %v1578_v41 }
  0x80   : > { %726 = vmatprep.mubr.bf16.mxu1 %v3350_v2  ;;  %1385 = vmatprep.mubr.bf16.mxu0 %v3350_v2 }
  0x87   : > { %2593 = vmatmul.mubr.msk.bf16.gmra.mrb[48].mxu1 %vm525_vm0, %v3070_v45  ;;  %2661 = vmatmul.mubr.msk.bf16.gmra.mrb[16].mxu0 %vm1264_vm1, %v3071_v46 }
  0x88   : > { %736 = vmatprep.mubr.bf16.mxu1 %v3350_v2  ;;  %1395 = vmatprep.mubr.bf16.mxu0 %v3350_v2 }
  0x8f   : > { %2594 = vmatmul.mubr.msk.bf16.gmra.mrb[52].mxu1 %vm525_vm0, %v3072_v47  ;;  %2662 = vmatmul.mubr.msk.bf16.gmra.mrb[20].mxu0 %vm1264_vm1, %v3073_v48 }
  0x90   : > { %746 = vmatprep.mubr.bf16.mxu1 %v3350_v2  ;;  %1405 = vmatprep.mubr.bf16.mxu0 %v3350_v2 }
  0x97   : > { %2595 = vmatmul.mubr.msk.bf16.gmra.mrb[56].mxu1 %vm525_vm0, %v3074_v49  ;;  %2663 = vmatmul.mubr.msk.bf16.gmra.mrb[24].mxu0 %vm1264_vm1, %v3075_v50 }
  0x98   : > { %756 = vmatprep.mubr.bf16.mxu1 %v3350_v2  ;;  %1415 = vmatprep.mubr.bf16.mxu0 %v3350_v2 }
  0x9f   : > { %2596 = vmatmul.mubr.msk.bf16.gmra.mrb[60].mxu1 %vm525_vm0, %v3076_v51  ;;  %2664 = vmatmul.mubr.msk.bf16.gmra.mrb[28].mxu0 %vm1264_vm1, %v3077_v52 }
  0xa0   : > { %1047 = vmatprep.mubr.bf16.mxu1 %v3350_v2  ;;  %1425 = vmatprep.mubr.bf16.mxu0 %v3350_v2 }
  0xa7   : > { %2629 = vmatmul.mubr.msk.bf16.vlgmr.msra.gmra.mrb[32].mxu1 %vm525_vm0, %v3078_v53  ;;  %2665 = vmatmul.mubr.msk.bf16.gmra.mrb[32].mxu0 %vm1264_vm1, %v3079_v54 }
  0xa8   : > { %1057 = vmatprep.mubr.bf16.mxu1 %v3350_v2  ;;  %1435 = vmatprep.mubr.bf16.mxu0 %v3350_v2 }
  0xaf   : > { %2630 = vmatmul.mubr.msk.bf16.gmra.mrb[36].mxu1 %vm525_vm0, %v3080_v55  ;;  %2666 = vmatmul.mubr.msk.bf16.gmra.mrb[36].mxu0 %vm1264_vm1, %v3081_v56 }
  0xb0   : > { %1067 = vmatprep.mubr.bf16.mxu1 %v3350_v2  ;;  %1445 = vmatprep.mubr.bf16.mxu0 %v3350_v2 }
  0xb7   : > { %2631 = vmatmul.mubr.msk.bf16.gmra.mrb[40].mxu1 %vm525_vm0, %v3082_v57  ;;  %2667 = vmatmul.mubr.msk.bf16.gmra.mrb[40].mxu0 %vm1264_vm1, %v3083_v58 }
  0xb8   : > { %1077 = vmatprep.mubr.bf16.mxu1 %v3350_v2  ;;  %1455 = vmatprep.mubr.bf16.mxu0 %v3350_v2 }
  0xbf   : > { %2632 = vmatmul.mubr.msk.bf16.gmra.mrb[44].mxu1 %vm525_vm0, %v3084_v59  ;;  %2668 = vmatmul.mubr.msk.bf16.gmra.mrb[44].mxu0 %vm1264_vm1, %v3085_v60 }
  0xc0   : > { %1087 = vmatprep.mubr.bf16.mxu1 %v3350_v2  ;;  %1465 = vmatprep.mubr.bf16.mxu0 %v3350_v2 }
  0xc7   : > { %2633 = vmatmul.mubr.msk.bf16.gmra.mrb[48].mxu1 %vm525_vm0, %v3086_v61  ;;  %2669 = vmatmul.mubr.msk.bf16.gmra.mrb[48].mxu0 %vm1264_vm1, %v3087_v62 }
  0xc8   : > { %1097 = vmatprep.mubr.bf16.mxu1 %v3350_v2  ;;  %1475 = vmatprep.mubr.bf16.mxu0 %v3350_v2 }
  0xcf   : > { %2634 = vmatmul.mubr.msk.bf16.gmra.mrb[52].mxu1 %vm525_vm0, %v3088_v63  ;;  %2670 = vmatmul.mubr.msk.bf16.gmra.mrb[52].mxu0 %vm1264_vm1, %v3089_v0 }
  0xd0   : > { %1107 = vmatprep.mubr.bf16.mxu1 %v3350_v2  ;;  %1485 = vmatprep.mubr.bf16.mxu0 %v3350_v2 }
  0xd7   : > { %2635 = vmatmul.mubr.msk.bf16.gmra.mrb[56].mxu1 %vm525_vm0, %v3090_v1  ;;  %2671 = vmatmul.mubr.msk.bf16.gmra.mrb[56].mxu0 %vm1264_vm1, %v3091_v3 }
  0xd8   : > { %1117 = vmatprep.mubr.bf16.mxu1 %v3350_v2  ;;  %1495 = vmatprep.mubr.bf16.mxu0 %v3350_v2 }
  0xdf   : > { %2636 = vmatmul.mubr.msk.bf16.gmra.mrb[60].mxu1 %vm525_vm0, %v3092_v4  ;;  %2672 = vmatmul.mubr.msk.bf16.gmra.mrb[60].mxu0 %vm1264_vm1, %v3093_v5 }
  0xfa   : > { %v608_v6 = vpop.f32.mrb[0].mxu1 }
  0xfb   : > { %v610_v7 = vpop.f32.mrb[1].mxu1 }
  0xfc   : > { %v612_v8 = vpop.f32.mrb[2].mxu1 }
  0xfd   : > { %v614_v9 = vpop.f32.mrb[3].mxu1 }
 0x102   : > { %v618_v10 = vpop.f32.mrb[4].mxu1 }
 0x103   : > { %v620_v11 = vpop.f32.mrb[5].mxu1 }
 0x104   : > { %v622_v12 = vpop.f32.mrb[6].mxu1 }
 0x105   : > { %v3667_v13 = vpop.f32.mrb[7].mxu1 }
 0x10a   : > { %v3669_v14 = vpop.f32.mrb[8].mxu1 }
 0x10b   : > { %v3671_v15 = vpop.f32.mrb[9].mxu1 }
 0x10c   : > { %v3673_v2 = vpop.f32.mrb[10].mxu1 }
 0x10d   : > { %v3675_v16 = vpop.f32.mrb[11].mxu1 }
 0x112   : > { %v3677_v17 = vpop.f32.mrb[12].mxu1 }
 0x113   : > { %v3679_v18 = vpop.f32.mrb[13].mxu1 }
 0x114   : > { %v3681_v19 = vpop.f32.mrb[14].mxu1 }
 0x115   : > { %v3683_v20 = vpop.f32.mrb[15].mxu1 }
 0x11a   : > { %v3685_v21 = vpop.f32.mrb[16].mxu1 }
 0x11b   : > { %v3687_v22 = vpop.f32.mrb[17].mxu1 }
 0x11c   : > { %v3689_v23 = vpop.f32.mrb[18].mxu1 }
 0x11d   : > { %v3691_v24 = vpop.f32.mrb[19].mxu1 }
 0x122   : > { %v3693_v25 = vpop.f32.mrb[20].mxu1 }
 0x123   : > { %v3695_v26 = vpop.f32.mrb[21].mxu1 }
 0x124   : > { %v3697_v27 = vpop.f32.mrb[22].mxu1 }
 0x125   : > { %v3699_v28 = vpop.f32.mrb[23].mxu1 }
 0x12a   : > { %v3701_v29 = vpop.f32.mrb[24].mxu1 }
 0x12b   : > { %v3703_v30 = vpop.f32.mrb[25].mxu1 }
 0x12c   : > { %v3705_v31 = vpop.f32.mrb[26].mxu1 }
 0x12d   : > { %v3707_v32 = vpop.f32.mrb[27].mxu1 }
 0x132   : > { %v3709_v35 = vpop.f32.mrb[28].mxu1 }
 0x133   : > { %v3711_v36 = vpop.f32.mrb[29].mxu1 }
 0x134   : > { %v3713_v37 = vpop.f32.mrb[30].mxu1 }
 0x135   : > { %v3715_v38 = vpop.f32.mrb[31].mxu1 }
 0x13a   : > { %v1347_v43 = vpop.f32.mrb[0].mxu0 }
 0x13b   : > { %v2846_v45 = vadd.f32 %v1347_v43, %v608_v6  ;;  %v1349_v46 = vpop.f32.mrb[1].mxu0 }
 0x13c   : > { %v2847_v47 = vadd.f32 %v1349_v46, %v610_v7  ;;  %v1351_v48 = vpop.f32.mrb[2].mxu0 }
 0x13d   : > { %v1582_v49 = vadd.f32 %v2846_v45, %v3720_v42  ;;  %v2848_v50 = vadd.f32 %v1351_v48, %v612_v8  ;;  %v1353_v51 = vpop.f32.mrb[3].mxu0 }
 0x13e   : > { %v3726_v52 = vadd.f32 %v2847_v47, %v3722_v44  ;;  %v2849_v53 = vadd.f32 %v1353_v51, %v614_v9 }
 0x13f   : > { %v1646_v56 = vmul.f32 0.5, %v1582_v49  ;;  %v1584_v57 = vadd.f32 %v2848_v50, %v3720_v42 }
 0x140   : > { %v1806_v54 = vand.u32 2147483647, %v3726_v52  ;;  %v3730_v55 = vadd.f32 %v2849_v53, %v3722_v44 }
 0x141   : > { %3094 = vtanh.f32 %v1646_v56  ;;  %v1647_v4 = vmul.f32 0.5, %v1584_v57 }
 0x142   : > { %v1838_v58 = vsub.f32 0.0, %v1806_v54  ;;  %v1807_v59 = vand.u32 2147483647, %v3730_v55  ;;  %v1357_v60 = vpop.f32.mrb[4].mxu0 }
 0x143   : > { %v2850_v61 = vadd.f32 %v1357_v60, %v618_v10  ;;  %v1359_v62 = vpop.f32.mrb[5].mxu0 }
 0x144   : > { %v1870_v63 = vmul.f32 1.442695, %v1838_v58  ;;  %v1839_v0 = vsub.f32 0.0, %v1807_v59  ;;  %v2851_v1 = vadd.f32 %v1359_v62, %v620_v11  ;;  %v1361_v3 = vpop.f32.mrb[6].mxu0 }
 0x145   : > { %v1586_v5 = vadd.f32 %v2850_v61, %v3720_v42  ;;  %v2852_v6 = vadd.f32 %v1361_v3, %v622_v12  ;;  %v1363_v7 = vpop.f32.mrb[7].mxu0 }
 0x146   : > { %3096 = vpow2.f32 %v1870_v63  ;;  %v1872_v8 = vmul.f32 1.442695, %v1839_v0  ;;  %v3736_v9 = vadd.f32 %v2851_v1, %v3722_v44  ;;  %v2853_v33 = vadd.f32 %v1363_v7, %v3667_v13 }
 0x147   : > { %v1648_v10 = vmul.f32 0.5, %v1586_v5  ;;  %v1588_v39 = vadd.f32 %v2852_v6, %v3720_v42  ;;  %v1774_v1 = vmax.f32 %v3726_v52, 0.0 }
 0x148   : > { %3098 = vpow2.f32 %v1872_v8  ;;  %v1808_v34 = vand.u32 2147483647, %v3736_v9  ;;  %v3741_v11 = vadd.f32 %v2853_v33, %v3722_v44  ;;  %v1776_v7 = vmax.f32 %v3736_v9, 0.0 }
 0x149   : > { %3100 = vtanh.f32 %v1647_v4  ;;  %v1649_v49 = vmul.f32 0.5, %v1588_v39  ;;  %v1775_v4 = vmax.f32 %v3730_v55, 0.0 }
 0x14a   : > { %v1840_v40 = vsub.f32 0.0, %v1808_v34  ;;  %v1809_v12 = vand.u32 2147483647, %v3741_v11  ;;  %v1367_v41 = vpop.f32.mrb[8].mxu0  ;;  %3102 = vtanh.f32 %v1648_v10  ;;  %v1777_v8 = vmax.f32 %v3741_v11, 0.0 }
 0x14b   : > { %v2854_v43 = vadd.f32 %v1367_v41, %v3669_v14  ;;  %v1369_v45 = vpop.f32.mrb[9].mxu0  ;;  %v3095_v54 = vpop.eup %3094 }
 0x14c   : > { %v1874_v46 = vmul.f32 1.442695, %v1840_v40  ;;  %v1841_v13 = vsub.f32 0.0, %v1809_v12  ;;  %v2855_v47 = vadd.f32 %v1369_v45, %v3671_v15  ;;  %v1371_v48 = vpop.f32.mrb[10].mxu0  ;;  %v1710_v15 = vmul.f32 0.5, %v3095_v54 }
 0x14d   : > { %v2856_v50 = vadd.f32 %v1371_v48, %v3673_v2  ;;  %v1373_v51 = vpop.f32.mrb[11].mxu0  ;;  %v1590_v60 = vadd.f32 %v2854_v43, %v3720_v42 }
 0x14e   : > { %3104 = vpow2.f32 %v1874_v46  ;;  %v1876_v53 = vmul.f32 1.442695, %v1841_v13  ;;  %v3749_v56 = vadd.f32 %v2855_v47, %v3722_v44  ;;  %v2857_v57 = vadd.f32 %v1373_v51, %v3675_v16 }
 0x14f   : > { %v3765_v39 = vadd.f32 0.5, %v1710_v15  ;;  %v1650_v12 = vmul.f32 0.5, %v1590_v60  ;;  %v1592_v41 = vadd.f32 %v2856_v50, %v3720_v42 }
 0x150   : > { %v3097_v14 = vpop.eup %3096  ;;  %3106 = vpow2.f32 %v1876_v53  ;;  %v1810_v2 = vand.u32 2147483647, %v3749_v56  ;;  %v3757_v61 = vadd.f32 %v2857_v57, %v3722_v44 }
 0x151   : > { %v1934_v58 = vadd.f32 1.0, %v3097_v14  ;;  %3108 = vtanh.f32 %v1649_v49  ;;  %v1937_v3 = vmul.f32 -0.5, %v3097_v14  ;;  %v1940_v49 = vand.u32 2147483647, %v3097_v14 }
 0x152   : > { %v3752_v59 = vpop.eup %3098  ;;  %v1377_v62 = vpop.f32.mrb[12].mxu0  ;;  %v1842_v5 = vsub.f32 0.0, %v1810_v2  ;;  %v1811_v33 = vand.u32 2147483647, %v3757_v61 }
 0x153   : > { %v3101_v63 = vpop.eup %3100  ;;  %3110 = vlog2.f32 %v1934_v58  ;;  %v1943_v0 = vadd.f32 1.0, %v3752_v59  ;;  %v1379_v16 = vpop.f32.mrb[13].mxu0  ;;  %v1946_v43 = vmul.f32 -0.5, %v3752_v59  ;;  %v2858_v13 = vadd.f32 %v1377_v62, %v3677_v17 }
 0x154   : > { %v1381_v6 = vpop.f32.mrb[14].mxu0  ;;  %v3103_v34 = vpop.eup %3102  ;;  %v1711_v40 = vmul.f32 0.5, %v3101_v63  ;;  %v1878_v45 = vmul.f32 1.442695, %v1842_v5  ;;  %v1843_v46 = vsub.f32 0.0, %v1811_v33  ;;  %v1938_v48 = vadd.f32 1.0, %v1937_v3 }
 0x155   : > { %3112 = vlog2.f32 %v1943_v0  ;;  %v1383_v10 = vpop.f32.mrb[15].mxu0  ;;  %v2859_v51 = vadd.f32 %v1379_v16, %v3679_v18  ;;  %v2860_v53 = vadd.f32 %v1381_v6, %v3681_v19  ;;  %v1949_v54 = vand.u32 2147483647, %v3752_v59 }
 0x156   : > { %v1712_v57 = vmul.f32 0.5, %v3103_v34  ;;  %3114 = vpow2.f32 %v1878_v45  ;;  %v1743_v15 = vadd.f32 0.5, %v1711_v40  ;;  %v1778_v17 = vmax.f32 %v3749_v56, 0.0 }
 0x157   : > { %3116 = vtanh.f32 %v1650_v12  ;;  %v1880_v60 = vmul.f32 1.442695, %v1843_v46  ;;  %v1947_v63 = vadd.f32 1.0, %v1946_v43  ;;  %v3781_v19 = vadd.f32 %v2859_v51, %v3722_v44 }
 0x158   : > { %v3770_v47 = vpop.eup %3104  ;;  %v1939_v16 = vmul.f32 %v3097_v14, %v1938_v48  ;;  %vm3783_vm2 = vcmp.lt.f32.partialorder %v1940_v49, 0.0004427343  ;;  %v1651_v5 = vmul.f32 0.5, %v1592_v41  ;;  %vm3789_vm3 = vcmp.lt.f32.partialorder %v1949_v54, 0.0004427343 }
 0x159   : > { %v1952_v58 = vadd.f32 1.0, %v3770_v47  ;;  %v3793_v40 = vadd.f32 0.5, %v1712_v57  ;;  %v1779_v12 = vmax.f32 %v3757_v61, 0.0  ;;  %v1955_v45 = vmul.f32 -0.5, %v3770_v47 }
 0x15a   : > { %v3776_v50 = vpop.eup %3106  ;;  %v1387_v2 = vpop.f32.mrb[16].mxu0  ;;  %v1594_v46 = vadd.f32 %v2858_v13, %v3720_v42  ;;  %v1948_v49 = vmul.f32 %v3752_v59, %v1947_v63  ;;  %v1812_v54 = vand.u32 2147483647, %v3781_v19  ;;  %v2861_v57 = vadd.f32 %v1383_v10, %v3683_v20 }
 0x15b   : > { %v3109_v62 = vpop.eup %3108  ;;  %3118 = vlog2.f32 %v1952_v58  ;;  %v1961_v18 = vadd.f32 1.0, %v3776_v50  ;;  %v1389_v0 = vpop.f32.mrb[17].mxu0  ;;  %v1964_v51 = vmul.f32 -0.5, %v3776_v50  ;;  %v1596_v63 = vadd.f32 %v2860_v53, %v3720_v42 }
 0x15c   : > { %3120 = vpow2.f32 %v1880_v60  ;;  %v3787_v6 = vpop.f32.mrb[18].mxu0  ;;  %v1713_v41 = vmul.f32 0.5, %v3109_v62  ;;  %v2862_v62 = vadd.f32 %v1387_v2, %v3685_v21  ;;  %v1844_v59 = vsub.f32 0.0, %v1812_v54 }
 0x15d   : > { %v3111_v33 = vpop.eup %3110  ;;  %3122 = vlog2.f32 %v1961_v18  ;;  %v3796_v14 = vpop.f32.mrb[19].mxu0  ;;  %v1958_v18 = vand.u32 2147483647, %v3770_v47  ;;  %v1956_v10 = vadd.f32 1.0, %v1955_v45  ;;  %v2863_v3 = vadd.f32 %v1389_v0, %v3687_v22 }
 0x15e   : > { %v1936_v43 = vmul.f32 0.6931472, %v3111_v33  ;;  %v3813_v33 = vadd.f32 %v2861_v57, %v3722_v44  ;;  %v1882_v53 = vmul.f32 1.442695, %v1844_v59  ;;  %v1745_v22 = vadd.f32 0.5, %v1713_v41 }
 0x15f   : > { %v3113_v48 = vpop.eup %3112  ;;  %vm3829_vm4 = vcmp.lt.f32.partialorder %v1958_v18, 0.0004427343  ;;  %3124 = vtanh.f32 %v1651_v5  ;;  %v1967_v54 = vand.u32 2147483647, %v3776_v50  ;;  %v1653_v41 = vmul.f32 0.5, %v1596_v63 }
 0x160   : > { %v1942_v58 = vsel %vm3783_vm2, %v1939_v16, %v1936_v43  ;;  %v1945_v60 = vmul.f32 0.6931472, %v3113_v48  ;;  %v1652_v16 = vmul.f32 0.5, %v1594_v46  ;;  %v3820_v48 = vpop.eup %3114  ;;  %3126 = vpow2.f32 %v1882_v53 }
 0x161   : > { %v2222_v13 = vadd.f32 %v1942_v58, %v1774_v1  ;;  %v1965_v1 = vadd.f32 1.0, %v1964_v51  ;;  %v3117_v34 = vpop.eup %3116  ;;  %v1970_v0 = vadd.f32 1.0, %v3820_v48  ;;  %v1813_v55 = vand.u32 2147483647, %v3813_v33 }
 0x162   : > { %v1951_v20 = vsel %vm3789_vm3, %v1948_v49, %v1945_v60  ;;  %v3818_v43 = vpop.f32.mrb[20].mxu0  ;;  %v1957_v58 = vmul.f32 %v3770_v47, %v1956_v10  ;;  %vm1968_vm5 = vcmp.lt.f32.partialorder %v1967_v54, 0.0004427343  ;;  %v1714_v53 = vmul.f32 0.5, %v3117_v34 }
 0x163   : > { %v2254_v21 = vmul.f32 %v2222_v13, %v3765_v39  ;;  %v2223_v52 = vadd.f32 %v1951_v20, %v1775_v4  ;;  %v1399_v2 = vpop.f32.mrb[21].mxu0  ;;  %3128 = vlog2.f32 %v1970_v0  ;;  %v1966_v18 = vmul.f32 %v3776_v50, %v1965_v1 }
 0x164   : > { %v1401_v46 = vpop.f32.mrb[22].mxu0  ;;  %3130 = vtanh.f32 %v1652_v16  ;;  %v1845_v20 = vsub.f32 0.0, %v1813_v55  ;;  %v1973_v50 = vmul.f32 -0.5, %v3820_v48  ;;  %v3860_v9 = vadd.f32 %v2863_v3, %v3722_v44 }
 0x165   : > { %v3119_v39 = vpop.eup %3118  ;;  %v2255_v49 = vmul.f32 %v2223_v52, %v1743_v15  ;;  %v3836_v4 = vpop.f32.mrb[23].mxu0  ;;  %v1598_v52 = vadd.f32 %v2862_v62, %v3720_v42  ;;  %v1780_v45 = vmax.f32 %v3781_v19, 0.0  ;;  %v1976_v55 = vand.u32 2147483647, %v3820_v48 }
 0x166   : > { %v3838_v51 = vpop.eup %3120  ;;  %v1954_v57 = vmul.f32 0.6931472, %v3119_v39  ;;  %v1884_v16 = vmul.f32 1.442695, %v1845_v20  ;;  %v2864_v39 = vadd.f32 %v3787_v6, %v3689_v23  ;;  %v1814_v11 = vand.u32 2147483647, %v3860_v9 }
 0x167   : > { %v3123_v60 = vpop.eup %3122  ;;  %v2746_v5 = vpack.c.bf16 %v2255_v49, %v2254_v21  ;;  %v1979_v15 = vadd.f32 1.0, %v3838_v51  ;;  %v1982_v10 = vmul.f32 -0.5, %v3838_v51  ;;  %v1654_v0 = vmul.f32 0.5, %v1598_v52 }
 0x168   : > { %v1960_v13 = vsel %vm3829_vm4, %v1957_v58, %v1954_v57  ;;  %v1963_v59 = vmul.f32 0.6931472, %v3123_v60  ;;  %v2866_v58 = vadd.f32 %v3818_v43, %v3693_v25  ;;  %v2867_v23 = vadd.f32 %v1399_v2, %v3695_v26 }
 0x169   : > { %2747 = vst [vmem:[%s3847_s15] sm:$0xff] %v2746_v5   ;;  %v2224_v47 = vadd.f32 %v1960_v13, %v1776_v7  ;;  %3132 = vlog2.f32 %v1979_v15  ;;  %v3125_v34 = vpop.eup %3124  ;;  %v1983_v57 = vadd.f32 1.0, %v1982_v10  ;;  %v1746_v5 = vadd.f32 0.5, %v1714_v53 }
 0x16a   : > { %v1969_v63 = vsel %vm1968_vm5, %v1966_v18, %v1963_v59  ;;  %3134 = vtanh.f32 %v1653_v41  ;;  %v3854_v21 = vpop.f32.mrb[24].mxu0  ;;  %v3878_v6 = vpop.eup %3126  ;;  %v1846_v41 = vsub.f32 0.0, %v1814_v11  ;;  %v1985_v18 = vand.u32 2147483647, %v3838_v51 }
 0x16b   : > { %v2256_v62 = vmul.f32 %v2224_v47, %v3793_v40  ;;  %v2225_v1 = vadd.f32 %v1969_v63, %v1777_v8  ;;  %v3862_v7 = vpop.f32.mrb[25].mxu0  ;;  %3136 = vpow2.f32 %v1884_v16  ;;  %v1974_v40 = vadd.f32 1.0, %v1973_v50 }
 0x16c   : > { %v3867_v49 = vpop.f32.mrb[26].mxu0  ;;  %v2865_v8 = vadd.f32 %v3796_v14, %v3691_v24  ;;  %v2868_v24 = vadd.f32 %v1401_v46, %v3697_v27  ;;  %v1988_v15 = vadd.f32 1.0, %v3878_v6  ;;  %v1600_v13 = vadd.f32 %v2864_v39, %v3720_v42 }
 0x16d   : > { %v2257_v54 = vmul.f32 %v2225_v1, %v1745_v22  ;;  %v3872_v3 = vpop.f32.mrb[27].mxu0  ;;  %v3129_v14 = vpop.eup %3128  ;;  %v1975_v43 = vmul.f32 %v3820_v48, %v1974_v40  ;;  %3138 = vtanh.f32 %v1654_v0  ;;  %v1886_v2 = vmul.f32 1.442695, %v1846_v41 }
 0x16e   : > { %v3881_v60 = vadd.f32 %v2865_v8, %v3722_v44  ;;  %v3131_v25 = vpop.eup %3130  ;;  %v1972_v26 = vmul.f32 0.6931472, %v3129_v14  ;;  %vm1977_vm6 = vcmp.lt.f32.partialorder %v1976_v55, 0.0004427343  ;;  %v1715_v59 = vmul.f32 0.5, %v3125_v34 }
 0x16f   : > { %v2751_v22 = vpack.c.bf16 %v2257_v54, %v2256_v62  ;;  %3140 = vlog2.f32 %v1988_v15  ;;  %v1984_v47 = vmul.f32 %v3838_v51, %v1983_v57  ;;  %v3892_v50 = vadd.f32 %v2867_v23, %v3722_v44 }
 0x170   : > { %v1815_v27 = vand.u32 2147483647, %v3881_v60  ;;  %v1978_v52 = vsel %vm1977_vm6, %v1975_v43, %v1972_v26  ;;  %3142 = vpow2.f32 %v1886_v2  ;;  %v1991_v62 = vmul.f32 -0.5, %v3878_v6 }
 0x171   : > { %2823 = vst [vmem:[%s3847_s15 + $0x8] sm:$0xff] %v2751_v22   ;;  %v2226_v48 = vadd.f32 %v1978_v52, %v1778_v17  ;;  %v1655_v1 = vmul.f32 0.5, %v1600_v13  ;;  %vm1986_vm7 = vcmp.lt.f32.partialorder %v1985_v18, 0.0004427343  ;;  %v1781_v0 = vmax.f32 %v3813_v33, 0.0 }
 0x172   : > { %v1417_v46 = vpop.f32.mrb[28].mxu0  ;;  %v1847_v51 = vsub.f32 0.0, %v1815_v27  ;;  %v1602_v39 = vadd.f32 %v2866_v58, %v3720_v42  ;;  %v1747_v8 = vadd.f32 0.5, %v1715_v59  ;;  %v1816_v17 = vand.u32 2147483647, %v3892_v50 }
 0x173   : > { %v3133_v20 = vpop.eup %3132  ;;  %v3894_v63 = vpop.f32.mrb[29].mxu0  ;;  %v2258_v11 = vmul.f32 %v2226_v48, %v1746_v5  ;;  %v1716_v55 = vmul.f32 0.5, %v3131_v25  ;;  %v1992_v22 = vadd.f32 1.0, %v1991_v62  ;;  %3144 = vtanh.f32 %v1655_v1 }
 0x174   : > { %v3135_v10 = vpop.eup %3134  ;;  %v1981_v16 = vmul.f32 0.6931472, %v3133_v20  ;;  %v3899_v53 = vpop.f32.mrb[30].mxu0  ;;  %v1888_v41 = vmul.f32 1.442695, %v1847_v51  ;;  %v1848_v58 = vsub.f32 0.0, %v1816_v17  ;;  %v2869_v13 = vadd.f32 %v3836_v4, %v3699_v28 }
 0x175   : > { %v3903_v54 = vpop.f32.mrb[31].mxu0  ;;  %v3905_v40 = vpop.eup %3136  ;;  %v1717_v57 = vmul.f32 0.5, %v3135_v10  ;;  %v1994_v18 = vand.u32 2147483647, %v3878_v6  ;;  %v1656_v5 = vmul.f32 0.5, %v1602_v39  ;;  %v2870_v61 = vadd.f32 %v3854_v21, %v3701_v29 }
 0x176   : > { %v1987_v56 = vsel %vm1986_vm7, %v1984_v47, %v1981_v16  ;;  %v1997_v23 = vadd.f32 1.0, %v3905_v40  ;;  %v1890_v15 = vmul.f32 1.442695, %v1848_v58  ;;  %v2000_v2 = vmul.f32 -0.5, %v3905_v40 }
 0x177   : > { %v2227_v34 = vadd.f32 %v1987_v56, %v1779_v12  ;;  %v3139_v26 = vpop.eup %3138  ;;  %v1604_v59 = vadd.f32 %v2868_v24, %v3720_v42  ;;  %v2871_v27 = vadd.f32 %v3862_v7, %v3703_v30  ;;  %v1993_v29 = vmul.f32 %v3878_v6, %v1992_v22 }
 0x178   : > { %3146 = vlog2.f32 %v1997_v23  ;;  %v3930_v21 = vadd.f32 %v2869_v13, %v3722_v44  ;;  %v3934_v52 = vadd.f32 %v3867_v49, %v3705_v31  ;;  %v2873_v6 = vadd.f32 %v3872_v3, %v3707_v32 }
 0x179   : > { %v2259_v14 = vmul.f32 %v2227_v34, %v1747_v8  ;;  %3148 = vpow2.f32 %v1888_v41  ;;  %v3141_v4 = vpop.eup %3140  ;;  %v3946_v10 = vadd.f32 %v1417_v46, %v3709_v35  ;;  %vm1995_vm8 = vcmp.lt.f32.partialorder %v1994_v18, 0.0004427343 }
 0x17a   : > { %v3916_v12 = vpop.f32.mrb[32].mxu1  ;;  %v3918_v25 = vpop.f32.mrb[32].mxu0  ;;  %3150 = vpow2.f32 %v1890_v15  ;;  %v1990_v7 = vmul.f32 0.6931472, %v3141_v4  ;;  %v2003_v31 = vand.u32 2147483647, %v3905_v40  ;;  %v3955_v62 = vadd.f32 %v2871_v27, %v3722_v44 }
 0x17b   : > { %v2756_v43 = vpack.c.bf16 %v2259_v14, %v2258_v11  ;;  %v3924_v20 = vpop.f32.mrb[33].mxu1  ;;  %v3926_v28 = vpop.f32.mrb[33].mxu0  ;;  %3152 = vtanh.f32 %v1656_v5  ;;  %v2001_v51 = vadd.f32 1.0, %v2000_v2  ;;  %v1657_v39 = vmul.f32 0.5, %v1604_v59 }
 0x17c   : > { %v3936_v47 = vpop.f32.mrb[34].mxu1  ;;  %v3938_v24 = vpop.f32.mrb[34].mxu0  ;;  %v1996_v1 = vsel %vm1995_vm8, %v1993_v29, %v1990_v7  ;;  %v1817_v32 = vand.u32 2147483647, %v3930_v21  ;;  %v1748_v3 = vadd.f32 0.5, %v1716_v55  ;;  %v1606_v46 = vadd.f32 %v2870_v61, %v3720_v42 }
 0x17d   : > { %v3940_v30 = vpop.eup %3142  ;;  %2824 = vst [vmem:[%s3847_s15 + $0x10] sm:$0xff] %v2756_v43   ;;  %v3948_v48 = vpop.f32.mrb[35].mxu1  ;;  %v2228_v35 = vadd.f32 %v1996_v1, %v1780_v45  ;;  %v1749_v11 = vadd.f32 0.5, %v1717_v57  ;;  %v1718_v8 = vmul.f32 0.5, %v3139_v26  ;;  %v1782_v56 = vmax.f32 %v3860_v9, 0.0 }
 0x17e   : > { %v3950_v16 = vpop.f32.mrb[35].mxu0  ;;  %v2006_v49 = vadd.f32 1.0, %v3940_v30  ;;  %v1849_v17 = vsub.f32 0.0, %v1817_v32  ;;  %v3145_v34 = vpop.eup %3144  ;;  %vm3962_vm9 = vcmp.lt.f32.partialorder %v2003_v31, 0.0004427343  ;;  %v2002_v58 = vmul.f32 %v3905_v40, %v2001_v51 }
 0x17f   : > { %v2260_v23 = vmul.f32 %v2228_v35, %v1748_v3  ;;  %v1818_v41 = vand.u32 2147483647, %v3955_v62  ;;  %v2009_v57 = vmul.f32 -0.5, %v3940_v30  ;;  %v1658_v61 = vmul.f32 0.5, %v1606_v46 }
 0x180   : > { %3154 = vlog2.f32 %v2006_v49  ;;  %v1892_v14 = vmul.f32 1.442695, %v1849_v17  ;;  %v2875_v43 = vadd.f32 %v3894_v63, %v3711_v36  ;;  %v2012_v40 = vand.u32 2147483647, %v3940_v30 }
 0x181   : > { %3156 = vtanh.f32 %v1657_v39  ;;  %v1850_v26 = vsub.f32 0.0, %v1818_v41  ;;  %v1719_v27 = vmul.f32 0.5, %v3145_v34  ;;  %v1783_v36 = vmax.f32 %v3881_v60, 0.0 }
 0x182   : > { %v3967_v55 = vpop.f32.mrb[36].mxu1  ;;  %v3969_v19 = vpop.f32.mrb[36].mxu0  ;;  %3158 = vpow2.f32 %v1892_v14  ;;  %v3997_v1 = vadd.f32 %v2873_v6, %v3722_v44  ;;  %v2010_v32 = vadd.f32 1.0, %v2009_v57  ;;  %v1750_v35 = vadd.f32 0.5, %v1718_v8 }
 0x183   : > { %v3147_v45 = vpop.eup %3146  ;;  %v3973_v18 = vpop.f32.mrb[37].mxu1  ;;  %v1894_v63 = vmul.f32 1.442695, %v1850_v26  ;;  %vm4004_vm10 = vcmp.lt.f32.partialorder %v2012_v40, 0.0004427343  ;;  %v4008_v6 = vadd.f32 0.5, %v1719_v27  ;;  %v1608_v40 = vadd.f32 %v3934_v52, %v3720_v42 }
 0x184   : > { %v3975_v5 = vpop.f32.mrb[37].mxu0  ;;  %v3977_v15 = vpop.eup %3148  ;;  %v1999_v13 = vmul.f32 0.6931472, %v3147_v45  ;;  %v1819_v8 = vand.u32 2147483647, %v3997_v1  ;;  %v2877_v52 = vadd.f32 %v3903_v54, %v3715_v38  ;;  %v4056_v54 = vadd.f32 %v3918_v25, %v3916_v12 }
 0x185   : > { %v3981_v2 = vpop.f32.mrb[38].mxu1  ;;  %v3983_v59 = vpop.f32.mrb[38].mxu0  ;;  %v2015_v4 = vadd.f32 1.0, %v3977_v15  ;;  %v2021_v26 = vand.u32 2147483647, %v3977_v15 }
 0x186   : > { %v3987_v29 = vpop.f32.mrb[39].mxu1  ;;  %v3989_v7 = vpop.f32.mrb[39].mxu0  ;;  %v2005_v49 = vsel %vm3962_vm9, %v2002_v58, %v1999_v13  ;;  %v1851_v27 = vsub.f32 0.0, %v1819_v8  ;;  %v4052_v38 = vadd.f32 %v2877_v52, %v3722_v44 }
 0x187   : > { %v3991_v31 = vpop.eup %3150  ;;  %v2229_v39 = vadd.f32 %v2005_v49, %v1781_v0  ;;  %3160 = vlog2.f32 %v2015_v4  ;;  %v2018_v0 = vmul.f32 -0.5, %v3977_v15  ;;  %v4024_v4 = vadd.f32 %v2875_v43, %v3722_v44 }
 0x188   : > { %v3153_v51 = vpop.eup %3152  ;;  %v2024_v46 = vadd.f32 1.0, %v3991_v31  ;;  %3162 = vtanh.f32 %v1658_v61  ;;  %v1896_v8 = vmul.f32 1.442695, %v1851_v27  ;;  %vm4059_vm11 = vcmp.lt.f32.partialorder %v2021_v26, 0.0004427343 }
 0x189   : > { %v2261_v34 = vmul.f32 %v2229_v39, %v1749_v11  ;;  %3164 = vpow2.f32 %v1894_v63  ;;  %v1720_v41 = vmul.f32 0.5, %v3153_v51  ;;  %v2011_v11 = vmul.f32 %v3940_v30, %v2010_v32 }
 0x18a   : > { %v3155_v33 = vpop.eup %3154  ;;  %3166 = vlog2.f32 %v2024_v46  ;;  %v4012_v45 = vpop.f32.mrb[40].mxu1  ;;  %v2027_v51 = vmul.f32 -0.5, %v3991_v31  ;;  %v2876_v39 = vadd.f32 %v3899_v53, %v3713_v37  ;;  %v1610_v37 = vadd.f32 %v3946_v10, %v3720_v42 }
 0x18b   : > { %v2761_v58 = vpack.c.bf16 %v2261_v34, %v2260_v23  ;;  %v2008_v57 = vmul.f32 0.6931472, %v3155_v33  ;;  %v4016_v13 = vpop.f32.mrb[40].mxu0  ;;  %v4018_v61 = vpop.f32.mrb[41].mxu1  ;;  %v2019_v34 = vadd.f32 1.0, %v2018_v0  ;;  %v1752_v33 = vadd.f32 0.5, %v1720_v41 }
 0x18c   : > { %v4026_v49 = vpop.f32.mrb[41].mxu0  ;;  %v4028_v23 = vpop.f32.mrb[42].mxu1  ;;  %v1820_v53 = vand.u32 2147483647, %v4024_v4  ;;  %v1659_v41 = vmul.f32 0.5, %v1608_v40  ;;  %v2028_v10 = vadd.f32 1.0, %v2027_v51  ;;  %3168 = vpow2.f32 %v1896_v8 }
 0x18d   : > { %v3157_v30 = vpop.eup %3156  ;;  %2825 = vst [vmem:[%s3847_s15 + $0x18] sm:$0xff] %v2761_v58   ;;  %v2014_v63 = vsel %vm4004_vm10, %v2011_v11, %v2008_v57  ;;  %v4038_v32 = vpop.f32.mrb[42].mxu0  ;;  %v2020_v14 = vmul.f32 %v3977_v15, %v2019_v34  ;;  %v2030_v12 = vand.u32 2147483647, %v3991_v31  ;;  %v1821_v26 = vand.u32 2147483647, %v4052_v38 }
 0x18e   : > { %v4040_v43 = vpop.f32.mrb[43].mxu1  ;;  %v2230_v46 = vadd.f32 %v2014_v63, %v1782_v56  ;;  %v4044_v22 = vpop.f32.mrb[43].mxu0  ;;  %v1721_v56 = vmul.f32 0.5, %v3157_v30  ;;  %v1852_v27 = vsub.f32 0.0, %v1820_v53  ;;  %v1660_v53 = vmul.f32 0.5, %v1610_v37 }
 0x18f   : > { %v4046_v58 = vpop.eup %3158  ;;  %v2029_v3 = vmul.f32 %v3991_v31, %v2028_v10  ;;  %vm2031_vm12 = vcmp.lt.f32.partialorder %v2030_v12, 0.0004427343  ;;  %v1853_v37 = vsub.f32 0.0, %v1821_v26  ;;  %v2879_v26 = vadd.f32 %v3926_v28, %v3924_v20 }
 0x190   : > { %v2262_v9 = vmul.f32 %v2230_v46, %v1750_v35  ;;  %v2033_v0 = vadd.f32 1.0, %v4046_v58  ;;  %v1898_v40 = vmul.f32 1.442695, %v1852_v27  ;;  %v2036_v15 = vmul.f32 -0.5, %v4046_v58 }
 0x191   : > { %v3161_v57 = vpop.eup %3160  ;;  %v4115_v20 = vadd.f32 %v2879_v26, %v3722_v44  ;;  %v4119_v28 = vadd.f32 %v3969_v19, %v3967_v55 }
 0x192   : > { %v3163_v63 = vpop.eup %3162  ;;  %v2017_v52 = vmul.f32 0.6931472, %v3161_v57  ;;  %3170 = vlog2.f32 %v2033_v0  ;;  %v4065_v25 = vpop.f32.mrb[44].mxu1  ;;  %v2037_v10 = vadd.f32 1.0, %v2036_v15  ;;  %v1614_v15 = vadd.f32 %v4056_v54, %v3720_v42 }
 0x193   : > { %v4067_v35 = vpop.eup %3164  ;;  %v4070_v30 = vpop.f32.mrb[44].mxu0  ;;  %3172 = vpow2.f32 %v1898_v40  ;;  %v1722_v60 = vmul.f32 0.5, %v3163_v63  ;;  %v1612_v40 = vadd.f32 %v2876_v39, %v3720_v42 }
 0x194   : > { %v4072_v46 = vpop.f32.mrb[45].mxu1  ;;  %v3167_v51 = vpop.eup %3166  ;;  %v2023_v8 = vsel %vm4059_vm11, %v2020_v14, %v2017_v52  ;;  %v2042_v34 = vadd.f32 1.0, %v4067_v35  ;;  %v4089_v14 = vadd.f32 0.5, %v1721_v56  ;;  %v2045_v56 = vmul.f32 -0.5, %v4067_v35 }
 0x195   : > { %4585 = vst [vmem:[#allocation5_spill] sm:$0xff] %v4072_v46  ;;  %v4078_v0 = vpop.f32.mrb[45].mxu0  ;;  %v4080_v57 = vpop.f32.mrb[46].mxu1  ;;  %v2231_v27 = vadd.f32 %v2023_v8, %v1783_v36  ;;  %v2026_v17 = vmul.f32 0.6931472, %v3167_v51  ;;  %v4588_v36 = vmax.f32 %v3892_v50, 0.0  ;;  %v2880_v50 = vadd.f32 %v3938_v24, %v3936_v47 }
 0x196   : > { %4586 = vst [vmem:[#allocation6_spill] sm:$0xff] %v4078_v0  ;;  %4587 = vst [vmem:[#allocation7_spill] sm:$0xff] %v4080_v57  ;;  %v4085_v46 = vpop.f32.mrb[46].mxu0  ;;  %v4087_v11 = vpop.f32.mrb[47].mxu1  ;;  %3174 = vlog2.f32 %v2042_v34  ;;  %v1900_v51 = vmul.f32 1.442695, %v1853_v37  ;;  %v2883_v47 = vadd.f32 %v3975_v5, %v3973_v18  ;;  %v2038_v18 = vmul.f32 %v4046_v58, %v2037_v10 }
 0x197   : > { %v4091_v52 = vpop.f32.mrb[47].mxu0  ;;  %v2263_v57 = vmul.f32 %v2231_v27, %v4008_v6  ;;  %v2032_v0 = vsel %vm2031_vm12, %v2029_v3, %v2026_v17  ;;  %3176 = vtanh.f32 %v1659_v41  ;;  %v2039_v3 = vand.u32 2147483647, %v4046_v58 }
 0x198   : > { %v2232_v31 = vadd.f32 %v2032_v0, %v4588_v36  ;;  %3178 = vtanh.f32 %v1660_v53  ;;  %v2881_v17 = vadd.f32 %v3950_v16, %v3948_v48  ;;  %v2046_v5 = vadd.f32 1.0, %v2045_v56 }
 0x199   : > { %v2766_v12 = vpack.c.bf16 %v2263_v57, %v2262_v9  ;;  %v4111_v9 = vpop.eup %3168  ;;  %3180 = vpow2.f32 %v1900_v51  ;;  %v1822_v53 = vand.u32 2147483647, %v4115_v20  ;;  %vm2040_vm13 = vcmp.lt.f32.partialorder %v2039_v3, 0.0004427343 }
 0x19a   : > { %v4100_v8 = vmul.f32 %v2232_v31, %v1752_v33  ;;  %v4107_v6 = vpop.f32.mrb[48].mxu1  ;;  %v4109_v39 = vpop.f32.mrb[48].mxu0  ;;  %v2048_v33 = vand.u32 2147483647, %v4067_v35  ;;  %v2051_v63 = vadd.f32 1.0, %v4111_v9  ;;  %v1754_v57 = vadd.f32 0.5, %v1722_v60 }
 0x19b   : > { %2826 = vst [vmem:[%s3847_s15 + $0x20] sm:$0xff] %v2766_v12   ;;  %v4123_v24 = vpop.f32.mrb[49].mxu1  ;;  %v4125_v48 = vpop.f32.mrb[49].mxu0  ;;  %v1661_v27 = vmul.f32 0.5, %v1612_v40  ;;  %v2054_v31 = vmul.f32 -0.5, %v4111_v9  ;;  %v1854_v12 = vsub.f32 0.0, %v1822_v53  ;;  %v4146_v51 = vadd.f32 %v2881_v17, %v3722_v44 }
 0x19c   : > { %v3171_v16 = vpop.eup %3170  ;;  %v4132_v34 = vpop.f32.mrb[50].mxu1  ;;  %3182 = vlog2.f32 %v2051_v63  ;;  %v4589_v10 = vmax.f32 %v3930_v21, 0.0  ;;  %vm4150_vm14 = vcmp.lt.f32.partialorder %v2048_v33, 0.0004427343  ;;  %v2047_v63 = vmul.f32 %v4067_v35, %v2046_v5 }
 0x19d   : > { %v4134_v55 = vpop.f32.mrb[50].mxu0  ;;  %v2035_v19 = vmul.f32 0.6931472, %v3171_v16  ;;  %v4138_v0 = vpop.f32.mrb[51].mxu1  ;;  %v1662_v17 = vmul.f32 0.5, %v1614_v15  ;;  %v1616_v33 = vadd.f32 %v2880_v50, %v3720_v42  ;;  %v4593_v50 = vmax.f32 %v3955_v62, 0.0 }
 0x19e   : > { %v4140_v37 = vpop.f32.mrb[51].mxu0  ;;  %v4142_v36 = vpop.eup %3172  ;;  %v1902_v21 = vmul.f32 1.442695, %v1854_v12  ;;  %v1823_v35 = vand.u32 2147483647, %v4146_v51 }
 0x19f   : > { %v2041_v54 = vsel %vm2040_vm13, %v2038_v18, %v2035_v19  ;;  %v2060_v40 = vadd.f32 1.0, %v4142_v36  ;;  %v2057_v19 = vand.u32 2147483647, %v4111_v9 }
 0x1a0   : > { %v3175_v58 = vpop.eup %3174  ;;  %v2233_v56 = vadd.f32 %v2041_v54, %v4589_v10 }
 0x1a1   : > { %v3177_v3 = vpop.eup %3176  ;;  %v2044_v16 = vmul.f32 0.6931472, %v3175_v58  ;;  %3184 = vlog2.f32 %v2060_v40  ;;  %v2055_v58 = vadd.f32 1.0, %v2054_v31  ;;  %v2063_v40 = vmul.f32 -0.5, %v4142_v36 }
 0x1a2   : > { %v3179_v18 = vpop.eup %3178  ;;  %v2265_v53 = vmul.f32 %v2233_v56, %v4089_v14  ;;  %v4160_v54 = vpop.f32.mrb[52].mxu1  ;;  %3186 = vtanh.f32 %v1661_v27  ;;  %v1723_v56 = vmul.f32 0.5, %v3177_v3  ;;  %v1663_v3 = vmul.f32 0.5, %v1616_v33 }
 0x1a3   : > { %v4162_v10 = vpop.f32.mrb[52].mxu0  ;;  %v2050_v60 = vsel %vm4150_vm14, %v2047_v63, %v2044_v16  ;;  %v4167_v15 = vpop.f32.mrb[53].mxu1  ;;  %v1724_v31 = vmul.f32 0.5, %v3179_v18  ;;  %3188 = vpow2.f32 %v1902_v21  ;;  %v1855_v16 = vsub.f32 0.0, %v1823_v35 }
 0x1a4   : > { %v4169_v5 = vpop.f32.mrb[53].mxu0  ;;  %v2771_v14 = vpack.c.bf16 %v2265_v53, %v4100_v8  ;;  %v2234_v12 = vadd.f32 %v2050_v60, %v4593_v50  ;;  %v4175_v41 = vpop.f32.mrb[54].mxu1  ;;  %v4182_v63 = vadd.f32 %v2883_v47, %v3722_v44  ;;  %3190 = vtanh.f32 %v1662_v17 }
 0x1a5   : > { %4592 = vst [vmem:[#allocation8_spill] sm:$0xff] %v4169_v5  ;;  %v4177_v26 = vpop.f32.mrb[54].mxu0  ;;  %v4179_v27 = vpop.eup %3180  ;;  %v2056_v53 = vmul.f32 %v4111_v9, %v2055_v58  ;;  %vm4191_vm15 = vcmp.lt.f32.partialorder %v2057_v19, 0.0004427343  ;;  %v2066_v18 = vand.u32 2147483647, %v4142_v36  ;;  %v2884_v9 = vadd.f32 %v3983_v59, %v3981_v2 }
 0x1a6   : > { %v4184_v5 = vpop.f32.mrb[55].mxu1  ;;  %v4186_v8 = vpop.f32.mrb[55].mxu0  ;;  %2827 = vst [vmem:[%s3847_s15 + $0x28] sm:$0xff] %v2771_v14   ;;  %v2266_v62 = vmul.f32 %v2234_v12, %v1754_v57  ;;  %v2069_v60 = vadd.f32 1.0, %v4179_v27  ;;  %v1904_v47 = vmul.f32 1.442695, %v1855_v16  ;;  %v1618_v14 = vadd.f32 %v4119_v28, %v3720_v42 }
 0x1a7   : > { %v3183_v21 = vpop.eup %3182  ;;  %v2064_v35 = vadd.f32 1.0, %v2063_v40  ;;  %v1824_v57 = vand.u32 2147483647, %v4182_v63  ;;  %v2885_v19 = vadd.f32 %v3989_v7, %v3987_v29  ;;  %v4205_v33 = vadd.f32 %v4016_v13, %v4012_v45 }
 0x1a8   : > { %3192 = vlog2.f32 %v2069_v60  ;;  %v2053_v12 = vmul.f32 0.6931472, %v3183_v21  ;;  %v2887_v58 = vadd.f32 %v4026_v49, %v4018_v61  ;;  %v2072_v2 = vmul.f32 -0.5, %v4179_v27 }
 0x1a9   : > { %3194 = vpow2.f32 %v1904_v47  ;;  %v1856_v17 = vsub.f32 0.0, %v1824_v57  ;;  %v4217_v59 = vadd.f32 %v2885_v19, %v3722_v44  ;;  %v4221_v29 = vadd.f32 %v4038_v32, %v4028_v23 }
 0x1aa   : > { %3196 = vtanh.f32 %v1663_v3  ;;  %v4209_v28 = vpop.f32.mrb[56].mxu1  ;;  %v4211_v40 = vpop.f32.mrb[56].mxu0  ;;  %v2059_v16 = vsel %vm4191_vm15, %v2056_v53, %v2053_v12  ;;  %v1755_v61 = vadd.f32 0.5, %v1723_v56  ;;  %v4596_v49 = vmax.f32 %v3997_v1, 0.0 }
 0x1ab   : > { %v4223_v7 = vpop.f32.mrb[57].mxu1  ;;  %v4225_v45 = vpop.f32.mrb[57].mxu0  ;;  %v1756_v3 = vadd.f32 0.5, %v1724_v31  ;;  %v1906_v53 = vmul.f32 1.442695, %v1856_v17  ;;  %v2065_v23 = vmul.f32 %v4142_v36, %v2064_v35  ;;  %v1664_v32 = vmul.f32 0.5, %v1618_v14 }
 0x1ac   : > { %v3185_v13 = vpop.eup %3184  ;;  %v2235_v60 = vadd.f32 %v2059_v16, %v4596_v49  ;;  %v4229_v50 = vpop.f32.mrb[58].mxu1  ;;  %v1825_v12 = vand.u32 2147483647, %v4217_v59  ;;  %vm2067_vm0 = vcmp.lt.f32.partialorder %v2066_v18, 0.0004427343  ;;  %v2073_v49 = vadd.f32 1.0, %v2072_v2 }
 0x1ad   : > { %v4231_v47 = vpop.f32.mrb[58].mxu0  ;;  %v3187_v21 = vpop.eup %3186  ;;  %v2062_v57 = vmul.f32 0.6931472, %v3185_v13  ;;  %v2075_v56 = vand.u32 2147483647, %v4179_v27  ;;  %3198 = vpow2.f32 %v1906_v53  ;;  %v4243_v36 = vadd.f32 %v2887_v58, %v3722_v44 }
 0x1ae   : > { %4597 = vst [vmem:[#allocation9_spill] sm:$0xff] %v4231_v47  ;;  %v2267_v19 = vmul.f32 %v2235_v60, %v1755_v61  ;;  %v4236_v1 = vpop.f32.mrb[59].mxu1  ;;  %v4238_v31 = vpop.f32.mrb[59].mxu0  ;;  %v1857_v13 = vsub.f32 0.0, %v1825_v12  ;;  %v4600_v18 = vmax.f32 %v4024_v4, 0.0  ;;  %v1620_v53 = vadd.f32 %v2884_v9, %v3720_v42 }
 0x1af   : > { %4598 = vst [vmem:[#allocation10_spill] sm:$0xff] %v4236_v1  ;;  %4599 = vst [vmem:[#allocation11_spill] sm:$0xff] %v4238_v31  ;;  %v4240_v17 = vpop.eup %3188  ;;  %v2068_v16 = vsel %vm2067_vm0, %v2065_v23, %v2062_v57  ;;  %v1725_v1 = vmul.f32 0.5, %v3187_v21  ;;  %3200 = vtanh.f32 %v1664_v32  ;;  %v1789_v2 = vmax.f32 %v4052_v38, 0.0 }
 0x1b0   : > { %v3191_v35 = vpop.eup %3190  ;;  %v2776_v14 = vpack.c.bf16 %v2267_v19, %v2266_v62  ;;  %v2236_v61 = vadd.f32 %v2068_v16, %v4600_v18  ;;  %v2078_v60 = vadd.f32 1.0, %v4240_v17  ;;  %v1908_v31 = vmul.f32 1.442695, %v1857_v13 }
 0x1b1   : > { %v2074_v12 = vmul.f32 %v4179_v27, %v2073_v49  ;;  %v1826_v9 = vand.u32 2147483647, %v4243_v36  ;;  %vm2076_vm1 = vcmp.lt.f32.partialorder %v2075_v56, 0.0004427343  ;;  %v1757_v16 = vadd.f32 0.5, %v1725_v1 }
 0x1b2   : > { %v3193_v47 = vpop.eup %3192  ;;  %2828 = vst [vmem:[%s3847_s15 + $0x30] sm:$0xff] %v2776_v14   ;;  %v2268_v57 = vmul.f32 %v2236_v61, %v1756_v3  ;;  %3202 = vlog2.f32 %v2078_v60  ;;  %v4251_v58 = vpop.f32.mrb[60].mxu1  ;;  %v1665_v3 = vmul.f32 0.5, %v1620_v53  ;;  %v2081_v14 = vmul.f32 -0.5, %v4240_v17 }
 0x1b3   : > { %v4253_v23 = vpop.f32.mrb[60].mxu0  ;;  %v4255_v62 = vpop.eup %3194  ;;  %v2071_v4 = vmul.f32 0.6931472, %v3193_v47  ;;  %3204 = vpow2.f32 %v1908_v31  ;;  %v1858_v18 = vsub.f32 0.0, %v1826_v9  ;;  %v1726_v49 = vmul.f32 0.5, %v3191_v35 }
 0x1b4   : > { %v3197_v21 = vpop.eup %3196  ;;  %v2087_v32 = vadd.f32 1.0, %v4255_v62  ;;  %v4260_v19 = vpop.f32.mrb[61].mxu1  ;;  %v1622_v56 = vadd.f32 %v4205_v33, %v3720_v42 }
 0x1b5   : > { %v4262_v38 = vpop.f32.mrb[61].mxu0  ;;  %v2077_v13 = vsel %vm2076_vm1, %v2074_v12, %v2071_v4  ;;  %v4265_v47 = vpop.f32.mrb[62].mxu1  ;;  %v1727_v53 = vmul.f32 0.5, %v3197_v21  ;;  %v1910_v1 = vmul.f32 1.442695, %v1858_v18  ;;  %v2889_v4 = vadd.f32 %v4044_v22, %v4040_v43 }
 0x1b6   : > { %v4267_v27 = vpop.f32.mrb[62].mxu0  ;;  %v2237_v31 = vadd.f32 %v2077_v13, %v1789_v2  ;;  %3206 = vlog2.f32 %v2087_v32  ;;  %v4271_v61 = vpop.f32.mrb[63].mxu1  ;;  %v4279_v12 = vadd.f32 %v4070_v30, %v4065_v25  ;;  %v4604_v2 = vld [vmem:[#allocation5_spill] sm:$0xff]  ;;  %v4605_v32 = vld [vmem:[#allocation6_spill] sm:$0xff]  ;;  %v4606_v13 = vld [vmem:[#allocation7_spill] sm:$0xff]  ;;  %v2082_v21 = vadd.f32 1.0, %v2081_v14 }
 0x1b7   : > { %4601 = vst [vmem:[#allocation12_spill] sm:$0xff] %v4267_v27  ;;  %4602 = vst [vmem:[#allocation13_spill] sm:$0xff] %v4271_v61  ;;  %v4273_v60 = vpop.f32.mrb[63].mxu0  ;;  %v4281_v9 = vpop.eup %3198  ;;  %3208 = vtanh.f32 %v1665_v3  ;;  %v2891_v33 = vadd.f32 %v4605_v32, %v4604_v2  ;;  %v2090_v18 = vmul.f32 -0.5, %v4255_v62  ;;  %v2084_v25 = vand.u32 2147483647, %v4240_v17 }
 0x1b8   : > { %4603 = vst [vmem:[#allocation14_spill] sm:$0xff] %v4273_v60  ;;  %v2269_v35 = vmul.f32 %v2237_v31, %v1757_v16  ;;  %v4287_v60 = vadd.f32 %v4085_v46, %v4606_v13  ;;  %v2096_v43 = vadd.f32 1.0, %v4281_v9  ;;  %3210 = vpow2.f32 %v1910_v1 }
 0x1b9   : > { %v1666_v30 = vmul.f32 0.5, %v1622_v56  ;;  %v4293_v3 = vadd.f32 %v2889_v4, %v3722_v44  ;;  %v3201_v16 = vpop.eup %3200  ;;  %v1758_v31 = vadd.f32 0.5, %v1726_v49  ;;  %v1790_v2 = vmax.f32 %v4115_v20, 0.0 }
 0x1ba   : > { %v2781_v22 = vpack.c.bf16 %v2269_v35, %v2268_v57  ;;  %v1791_v46 = vmax.f32 %v4146_v51, 0.0  ;;  %3212 = vlog2.f32 %v2096_v43  ;;  %v1759_v32 = vadd.f32 0.5, %v1727_v53 }
 0x1bb   : > { %v2093_v13 = vand.u32 2147483647, %v4255_v62  ;;  %v1792_v57 = vmax.f32 %v4182_v63, 0.0  ;;  %v1827_v1 = vand.u32 2147483647, %v4293_v3  ;;  %v2083_v35 = vmul.f32 %v4240_v17, %v2082_v21 }
 0x1bc   : > { %v3203_v14 = vpop.eup %3202  ;;  %2829 = vst [vmem:[%s3847_s15 + $0x38] sm:$0xff] %v2781_v22   ;;  %v2091_v49 = vadd.f32 1.0, %v2090_v18  ;;  %v4305_v20 = vadd.f32 %v2891_v33, %v3722_v44  ;;  %vm2085_vm2 = vcmp.lt.f32.partialorder %v2084_v25, 0.0004427343  ;;  %v2099_v51 = vmul.f32 -0.5, %v4281_v9 }
 0x1bd   : > { %v4301_v56 = vpop.eup %3204  ;;  %v2080_v4 = vmul.f32 0.6931472, %v3203_v14  ;;  %3214 = vtanh.f32 %v1666_v30  ;;  %v1728_v22 = vmul.f32 0.5, %v3201_v16  ;;  %v1624_v63 = vadd.f32 %v4221_v29, %v3720_v42 }
 0x1be   : > { %v2105_v53 = vadd.f32 1.0, %v4301_v56  ;;  %v1859_v61 = vsub.f32 0.0, %v1827_v1  ;;  %vm4311_vm3 = vcmp.lt.f32.partialorder %v2093_v13, 0.0004427343  ;;  %v2102_v33 = vand.u32 2147483647, %v4281_v9 }
 0x1bf   : > { %v2086_v43 = vsel %vm2085_vm2, %v2083_v35, %v2080_v4  ;;  %v2092_v18 = vmul.f32 %v4255_v62, %v2091_v49  ;;  %v1828_v30 = vand.u32 2147483647, %v4305_v20  ;;  %v2100_v35 = vadd.f32 1.0, %v2099_v51 }
 0x1c0   : > { %v3207_v27 = vpop.eup %3206  ;;  %v2238_v14 = vadd.f32 %v2086_v43, %v1790_v2  ;;  %3216 = vlog2.f32 %v2105_v53  ;;  %v1912_v25 = vmul.f32 1.442695, %v1859_v61  ;;  %v2893_v29 = vadd.f32 %v4091_v52, %v4087_v11 }
 0x1c1   : > { %v2089_v21 = vmul.f32 0.6931472, %v3207_v27  ;;  %v3209_v16 = vpop.eup %3208  ;;  %v4322_v2 = vadd.f32 %v4109_v39, %v4107_v6  ;;  %v2108_v62 = vmul.f32 -0.5, %v4301_v56  ;;  %v1860_v61 = vsub.f32 0.0, %v1828_v30 }
 0x1c2   : > { %v2270_v4 = vmul.f32 %v2238_v14, %v1758_v31  ;;  %v4324_v13 = vpop.eup %3210  ;;  %3218 = vpow2.f32 %v1912_v25  ;;  %v1760_v49 = vadd.f32 0.5, %v1728_v22  ;;  %v1667_v51 = vmul.f32 0.5, %v1624_v63 }
 0x1c3   : > { %v2095_v27 = vsel %vm4311_vm3, %v2092_v18, %v2089_v21  ;;  %v2114_v31 = vadd.f32 1.0, %v4324_v13  ;;  %v1729_v11 = vmul.f32 0.5, %v3209_v16  ;;  %v1626_v52 = vadd.f32 %v4279_v12, %v3720_v42 }
 0x1c4   : > { %v2239_v1 = vadd.f32 %v2095_v27, %v1791_v46  ;;  %v3213_v53 = vpop.eup %3212  ;;  %v1914_v6 = vmul.f32 1.442695, %v1860_v61  ;;  %v4333_v39 = vadd.f32 %v2893_v29, %v3722_v44  ;;  %v2101_v17 = vmul.f32 %v4281_v9, %v2100_v35 }
 0x1c5   : > { %v2098_v14 = vmul.f32 0.6931472, %v3213_v53  ;;  %3220 = vlog2.f32 %v2114_v31  ;;  %vm2103_vm4 = vcmp.lt.f32.partialorder %v2102_v33, 0.0004427343  ;;  %v2109_v46 = vadd.f32 1.0, %v2108_v62 }
 0x1c6   : > { %v2271_v43 = vmul.f32 %v2239_v1, %v1759_v32  ;;  %v2111_v22 = vand.u32 2147483647, %v4301_v56  ;;  %3222 = vpow2.f32 %v1914_v6  ;;  %v2117_v12 = vmul.f32 -0.5, %v4324_v13 }
 0x1c7   : > { %v3215_v63 = vpop.eup %3214  ;;  %v2104_v18 = vsel %vm2103_vm4, %v2101_v17, %v2098_v14  ;;  %v1829_v25 = vand.u32 2147483647, %v4333_v39  ;;  %v1668_v16 = vmul.f32 0.5, %v1626_v52  ;;  %v2895_v32 = vadd.f32 %v4125_v48, %v4123_v24 }
 0x1c8   : > { %v2786_v21 = vpack.c.bf16 %v2271_v43, %v2270_v4  ;;  %v2240_v30 = vadd.f32 %v2104_v18, %v1792_v57  ;;  %v4343_v9 = vadd.f32 %v4134_v55, %v4132_v34  ;;  %3224 = vtanh.f32 %v1667_v51 }
 0x1c9   : > { %v1861_v35 = vsub.f32 0.0, %v1829_v25  ;;  %v2897_v4 = vadd.f32 %v4140_v37, %v4138_v0  ;;  %v4350_v29 = vadd.f32 %v4162_v10, %v4160_v54  ;;  %v2110_v62 = vmul.f32 %v4301_v56, %v2109_v46 }
 0x1ca   : > { %v3217_v33 = vpop.eup %3216  ;;  %2830 = vst [vmem:[%s3847_s15 + $0x40] sm:$0xff] %v2786_v21   ;;  %v2272_v57 = vmul.f32 %v2240_v30, %v1760_v49  ;;  %v4354_v24 = vadd.f32 %v2895_v32, %v3722_v44  ;;  %v1793_v48 = vmax.f32 %v4217_v59, 0.0  ;;  %vm2112_vm5 = vcmp.lt.f32.partialorder %v2111_v22, 0.0004427343 }
 0x1cb   : > { %v2107_v27 = vmul.f32 0.6931472, %v3217_v33  ;;  %v2118_v34 = vadd.f32 1.0, %v2117_v12  ;;  %v1916_v55 = vmul.f32 1.442695, %v1861_v35  ;;  %3226 = vtanh.f32 %v1668_v16  ;;  %v4609_v33 = vld [vmem:[#allocation8_spill] sm:$0xff] }
 0x1cc   : > { %v4357_v61 = vpop.eup %3218  ;;  %v1830_v0 = vand.u32 2147483647, %v4354_v24  ;;  %v1761_v37 = vadd.f32 0.5, %v1729_v11  ;;  %v2120_v10 = vand.u32 2147483647, %v4324_v13  ;;  %v1730_v49 = vmul.f32 0.5, %v3215_v63 }
 0x1cd   : > { %v2113_v1 = vsel %vm2112_vm5, %v2110_v62, %v2107_v27  ;;  %v2123_v56 = vadd.f32 1.0, %v4357_v61  ;;  %v1628_v31 = vadd.f32 %v4287_v60, %v3720_v42  ;;  %3228 = vpow2.f32 %v1916_v55 }
 0x1ce   : > { %v2241_v54 = vadd.f32 %v2113_v1, %v1793_v48  ;;  %v1862_v59 = vsub.f32 0.0, %v1830_v0  ;;  %v2119_v52 = vmul.f32 %v4324_v13, %v2118_v34  ;;  %v4366_v6 = vadd.f32 %v2897_v4, %v3722_v44 }
 0x1cf   : > { %v3221_v51 = vpop.eup %3220  ;;  %3230 = vlog2.f32 %v2123_v56  ;;  %v2126_v14 = vmul.f32 -0.5, %v4357_v61  ;;  %v1630_v17 = vadd.f32 %v4322_v2, %v3720_v42  ;;  %v1794_v22 = vmax.f32 %v4243_v36, 0.0 }
 0x1d0   : > { %v2273_v53 = vmul.f32 %v2241_v54, %v1761_v37  ;;  %v4368_v11 = vpop.eup %3222  ;;  %v2116_v43 = vmul.f32 0.6931472, %v3221_v51  ;;  %v1918_v60 = vmul.f32 1.442695, %v1862_v59  ;;  %vm2121_vm6 = vcmp.lt.f32.partialorder %v2120_v10, 0.0004427343 }
 0x1d1   : > { %v2132_v13 = vadd.f32 1.0, %v4368_v11  ;;  %v1762_v63 = vadd.f32 0.5, %v1730_v49  ;;  %v1795_v18 = vmax.f32 %v4293_v3, 0.0  ;;  %v1669_v30 = vmul.f32 0.5, %v1628_v31 }
 0x1d2   : > { %v2791_v46 = vpack.c.bf16 %v2273_v53, %v2272_v57  ;;  %v2122_v21 = vsel %vm2121_vm6, %v2119_v52, %v2116_v43  ;;  %3232 = vpow2.f32 %v1918_v60  ;;  %v3225_v12 = vpop.eup %3224  ;;  %v1831_v16 = vand.u32 2147483647, %v4366_v6 }
 0x1d3   : > { %v2242_v25 = vadd.f32 %v2122_v21, %v1794_v22  ;;  %3234 = vlog2.f32 %v2132_v13  ;;  %v2127_v2 = vadd.f32 1.0, %v2126_v14  ;;  %v1670_v32 = vmul.f32 0.5, %v1630_v17 }
 0x1d4   : > { %2831 = vst [vmem:[%s3847_s15 + $0x48] sm:$0xff] %v2791_v46   ;;  %v2899_v36 = vadd.f32 %v4609_v33, %v4167_v15  ;;  %v2900_v35 = vadd.f32 %v4177_v26, %v4175_v41  ;;  %v2135_v3 = vmul.f32 -0.5, %v4368_v11  ;;  %v1863_v57 = vsub.f32 0.0, %v1831_v16 }
 0x1d5   : > { %v4382_v4 = vmul.f32 %v2242_v25, %v1762_v63  ;;  %v2901_v27 = vadd.f32 %v4186_v8, %v4184_v5  ;;  %v3227_v62 = vpop.eup %3226  ;;  %v1731_v48 = vmul.f32 0.5, %v3225_v12  ;;  %v1796_v34 = vmax.f32 %v4305_v20, 0.0 }
 0x1d6   : > { %v4389_v55 = vadd.f32 %v2899_v36, %v3722_v44  ;;  %v4393_v15 = vadd.f32 %v4211_v40, %v4209_v28  ;;  %v2129_v41 = vand.u32 2147483647, %v4357_v61  ;;  %3236 = vtanh.f32 %v1669_v30 }
 0x1d7   : > { %v1920_v26 = vmul.f32 1.442695, %v1863_v57  ;;  %v2903_v1 = vadd.f32 %v4225_v45, %v4223_v7  ;;  %v4398_v0 = vpop.eup %3228  ;;  %3238 = vtanh.f32 %v1670_v32  ;;  %v1632_v5 = vadd.f32 %v4343_v9, %v3720_v42 }
 0x1d8   : > { %v1832_v8 = vand.u32 2147483647, %v4389_v55  ;;  %v4404_v20 = vadd.f32 %v2901_v27, %v3722_v44  ;;  %v2128_v40 = vmul.f32 %v4357_v61, %v2127_v2  ;;  %v1732_v37 = vmul.f32 0.5, %v3227_v62  ;;  %v4611_v62 = vld [vmem:[#allocation10_spill] sm:$0xff] }
 0x1d9   : > { %v3231_v28 = vpop.eup %3230  ;;  %v2136_v54 = vadd.f32 1.0, %v2135_v3  ;;  %v2141_v10 = vadd.f32 1.0, %v4398_v0  ;;  %3240 = vpow2.f32 %v1920_v26  ;;  %v1634_v7 = vadd.f32 %v4350_v29, %v3720_v42  ;;  %v4610_v3 = vld [vmem:[#allocation9_spill] sm:$0xff] }
 0x1da   : > { %v2125_v56 = vmul.f32 0.6931472, %v3231_v28  ;;  %v1864_v45 = vsub.f32 0.0, %v1832_v8  ;;  %v1763_v49 = vadd.f32 0.5, %v1731_v48  ;;  %vm2130_vm7 = vcmp.lt.f32.partialorder %v2129_v41, 0.0004427343 }
 0x1db   : > { %v2138_v9 = vand.u32 2147483647, %v4368_v11  ;;  %3242 = vlog2.f32 %v2141_v10  ;;  %v1671_v51 = vmul.f32 0.5, %v1632_v5  ;;  %v1833_v53 = vand.u32 2147483647, %v4404_v20 }
 0x1dc   : > { %v4411_v31 = vpop.eup %3232  ;;  %v2131_v59 = vsel %vm2130_vm7, %v2128_v40, %v2125_v56  ;;  %v1922_v61 = vmul.f32 1.442695, %v1864_v45  ;;  %v1764_v14 = vadd.f32 0.5, %v1732_v37  ;;  %v2144_v17 = vmul.f32 -0.5, %v4398_v0 }
 0x1dd   : > { %v3235_v52 = vpop.eup %3234  ;;  %v2243_v43 = vadd.f32 %v2131_v59, %v1795_v18  ;;  %v2150_v29 = vadd.f32 1.0, %v4411_v31  ;;  %v2137_v46 = vmul.f32 %v4368_v11, %v2136_v54  ;;  %v1672_v22 = vmul.f32 0.5, %v1634_v7 }
 0x1de   : > { %v2134_v60 = vmul.f32 0.6931472, %v3235_v52  ;;  %3244 = vpow2.f32 %v1922_v61  ;;  %vm2139_vm8 = vcmp.lt.f32.partialorder %v2138_v9, 0.0004427343  ;;  %v1865_v63 = vsub.f32 0.0, %v1833_v53 }
 0x1df   : > { %v2275_v13 = vmul.f32 %v2243_v43, %v1763_v49  ;;  %3246 = vlog2.f32 %v2150_v29  ;;  %v1636_v12 = vadd.f32 %v2900_v35, %v3720_v42  ;;  %v4419_v18 = vadd.f32 %v2903_v1, %v3722_v44 }
 0x1e0   : > { %v2140_v21 = vsel %vm2139_vm8, %v2137_v46, %v2134_v60  ;;  %3248 = vtanh.f32 %v1671_v51  ;;  %v3237_v25 = vpop.eup %3236  ;;  %v2145_v2 = vadd.f32 1.0, %v2144_v17  ;;  %v1924_v11 = vmul.f32 1.442695, %v1865_v63 }
 0x1e1   : > { %v2796_v30 = vpack.c.bf16 %v2275_v13, %v4382_v4  ;;  %v2244_v16 = vadd.f32 %v2140_v21, %v1796_v34  ;;  %v3239_v32 = vpop.eup %3238  ;;  %v2153_v33 = vmul.f32 -0.5, %v4411_v31  ;;  %3250 = vtanh.f32 %v1672_v22  ;;  %v4612_v4 = vld [vmem:[#allocation11_spill] sm:$0xff] }
 0x1e2   : > { %v1834_v36 = vand.u32 2147483647, %v4419_v18  ;;  %v4426_v57 = vadd.f32 %v4610_v3, %v4229_v50  ;;  %v2147_v27 = vand.u32 2147483647, %v4398_v0  ;;  %3252 = vpow2.f32 %v1924_v11 }
 0x1e3   : > { %2832 = vst [vmem:[%s3847_s15 + $0x50] sm:$0xff] %v2796_v30   ;;  %v2276_v35 = vmul.f32 %v2244_v16, %v1764_v14  ;;  %v2905_v48 = vadd.f32 %v4612_v4, %v4611_v62  ;;  %v4432_v34 = vpop.eup %3240  ;;  %v1797_v41 = vmax.f32 %v4333_v39, 0.0  ;;  %v4437_v1 = vadd.f32 %v4253_v23, %v4251_v58 }
 0x1e4   : > { %v1866_v26 = vsub.f32 0.0, %v1834_v36  ;;  %v1733_v50 = vmul.f32 0.5, %v3237_v25  ;;  %v2146_v8 = vmul.f32 %v4398_v0, %v2145_v2  ;;  %v1734_v28 = vmul.f32 0.5, %v3239_v32 }
 0x1e5   : > { %v3243_v5 = vpop.eup %3242  ;;  %v2159_v40 = vadd.f32 1.0, %v4432_v34  ;;  %v2154_v54 = vadd.f32 1.0, %v2153_v33  ;;  %v4442_v56 = vadd.f32 %v2905_v48, %v3722_v44  ;;  %vm2148_vm9 = vcmp.lt.f32.partialorder %v2147_v27, 0.0004427343  ;;  %v4613_v33 = vld [vmem:[#allocation12_spill] sm:$0xff] }
 0x1e6   : > { %v2143_v37 = vmul.f32 0.6931472, %v3243_v5  ;;  %v1926_v10 = vmul.f32 1.442695, %v1866_v26  ;;  %v2156_v39 = vand.u32 2147483647, %v4411_v31  ;;  %v1638_v0 = vadd.f32 %v4393_v15, %v3720_v42 }
 0x1e7   : > { %3254 = vlog2.f32 %v2159_v40  ;;  %v1673_v7 = vmul.f32 0.5, %v1636_v12  ;;  %v1835_v45 = vand.u32 2147483647, %v4442_v56  ;;  %v1765_v9 = vadd.f32 0.5, %v1733_v50  ;;  %v4616_v26 = vld [vmem:[#allocation13_spill] sm:$0xff] }
 0x1e8   : > { %v4445_v58 = vpop.eup %3244  ;;  %v2149_v23 = vsel %vm2148_vm9, %v2146_v8, %v2143_v37  ;;  %3256 = vpow2.f32 %v1926_v10  ;;  %v1798_v51 = vmax.f32 %v4354_v24, 0.0  ;;  %v1766_v52 = vadd.f32 0.5, %v1734_v28 }
 0x1e9   : > { %v3247_v49 = vpop.eup %3246  ;;  %v2245_v59 = vadd.f32 %v2149_v23, %v1797_v41  ;;  %v2168_v61 = vadd.f32 1.0, %v4445_v58  ;;  %v2155_v14 = vmul.f32 %v4411_v31, %v2154_v54  ;;  %v2162_v17 = vmul.f32 -0.5, %v4432_v34 }
 0x1ea   : > { %v3249_v53 = vpop.eup %3248  ;;  %v2152_v43 = vmul.f32 0.6931472, %v3247_v49  ;;  %vm2157_vm10 = vcmp.lt.f32.partialorder %v2156_v39, 0.0004427343  ;;  %v1867_v15 = vsub.f32 0.0, %v1835_v45  ;;  %v1674_v22 = vmul.f32 0.5, %v1638_v0 }
 0x1eb   : > { %v2277_v29 = vmul.f32 %v2245_v59, %v1765_v9  ;;  %3258 = vlog2.f32 %v2168_v61  ;;  %v3251_v60 = vpop.eup %3250  ;;  %v2907_v24 = vadd.f32 %v4262_v38, %v4260_v19  ;;  %v2165_v31 = vand.u32 2147483647, %v4432_v34 }
 0x1ec   : > { %v2158_v46 = vsel %vm2157_vm10, %v2155_v14, %v2152_v43  ;;  %3260 = vtanh.f32 %v1673_v7  ;;  %v4456_v13 = vpop.eup %3252  ;;  %v1928_v12 = vmul.f32 1.442695, %v1867_v15  ;;  %v2163_v25 = vadd.f32 1.0, %v2162_v17 }
 0x1ed   : > { %v2801_v63 = vpack.c.bf16 %v2277_v29, %v2276_v35  ;;  %v2246_v21 = vadd.f32 %v2158_v46, %v1798_v51  ;;  %v2171_v30 = vmul.f32 -0.5, %v4445_v58  ;;  %v2177_v16 = vadd.f32 1.0, %v4456_v13 }
 0x1ee   : > { %v1799_v11 = vmax.f32 %v4366_v6, 0.0  ;;  %3262 = vpow2.f32 %v1928_v12  ;;  %v4464_v32 = vadd.f32 %v2907_v24, %v3722_v44  ;;  %v1735_v19 = vmul.f32 0.5, %v3249_v53 }
 0x1ef   : > { %2833 = vst [vmem:[%s3847_s15 + $0x58] sm:$0xff] %v2801_v63   ;;  %v2278_v2 = vmul.f32 %v2246_v21, %v1766_v52  ;;  %v1736_v38 = vmul.f32 0.5, %v3251_v60  ;;  %3264 = vlog2.f32 %v2177_v16  ;;  %v4468_v36 = vadd.f32 %v4613_v33, %v4265_v47  ;;  %v4617_v47 = vld [vmem:[#allocation14_spill] sm:$0xff] }
 0x1f0   : > { %vm4470_vm11 = vcmp.lt.f32.partialorder %v2165_v31, 0.0004427343  ;;  %3266 = vtanh.f32 %v1674_v22  ;;  %v1640_v6 = vadd.f32 %v4426_v57, %v3720_v42  ;;  %v1836_v27 = vand.u32 2147483647, %v4464_v32 }
 0x1f1   : > { %v3255_v3 = vpop.eup %3254  ;;  %v2164_v48 = vmul.f32 %v4432_v34, %v2163_v25  ;;  %v2172_v41 = vadd.f32 1.0, %v2171_v30  ;;  %v2909_v5 = vadd.f32 %v4617_v47, %v4616_v26  ;;  %v2174_v50 = vand.u32 2147483647, %v4445_v58 }
 0x1f2   : > { %v4477_v62 = vpop.eup %3256  ;;  %v2161_v4 = vmul.f32 0.6931472, %v3255_v3  ;;  %v2180_v8 = vmul.f32 -0.5, %v4456_v13  ;;  %v1868_v40 = vsub.f32 0.0, %v1836_v27  ;;  %v1800_v37 = vmax.f32 %v4389_v55, 0.0 }
 0x1f3   : > { %v2186_v28 = vadd.f32 1.0, %v4477_v62  ;;  %v4489_v54 = vadd.f32 %v2909_v5, %v3722_v44  ;;  %v1767_v10 = vadd.f32 0.5, %v1735_v19  ;;  %v1675_v7 = vmul.f32 0.5, %v1640_v6 }
 0x1f4   : > { %v2167_v57 = vsel %vm4470_vm11, %v2164_v48, %v2161_v4  ;;  %v1768_v0 = vadd.f32 0.5, %v1736_v38  ;;  %v2173_v49 = vmul.f32 %v4445_v58, %v2172_v41  ;;  %v1930_v9 = vmul.f32 1.442695, %v1868_v40 }
 0x1f5   : > { %v3259_v34 = vpop.eup %3258  ;;  %v2247_v39 = vadd.f32 %v2167_v57, %v1799_v11  ;;  %3268 = vlog2.f32 %v2186_v28  ;;  %vm2175_vm12 = vcmp.lt.f32.partialorder %v2174_v50, 0.0004427343  ;;  %v2181_v51 = vadd.f32 1.0, %v2180_v8 }
 0x1f6   : > { %v3261_v23 = vpop.eup %3260  ;;  %v2170_v45 = vmul.f32 0.6931472, %v3259_v34  ;;  %v1837_v55 = vand.u32 2147483647, %v4489_v54  ;;  %v2183_v44 = vand.u32 2147483647, %v4456_v13  ;;  %3270 = vpow2.f32 %v1930_v9 }
 0x1f7   : > { %v2279_v59 = vmul.f32 %v2247_v39, %v1767_v10  ;;  %v2189_v53 = vmul.f32 -0.5, %v4477_v62  ;;  %3272 = vtanh.f32 %v1675_v7  ;;  %v1737_v58 = vmul.f32 0.5, %v3261_v23 }
 0x1f8   : > { %v2176_v61 = vsel %vm2175_vm12, %v2173_v49, %v2170_v45  ;;  %v3263_v52 = vpop.eup %3262  ;;  %v1869_v17 = vsub.f32 0.0, %v1837_v55  ;;  %v1642_v60 = vadd.f32 %v4437_v1, %v3720_v42  ;;  %v2182_v63 = vmul.f32 %v4456_v13, %v2181_v51 }
 0x1f9   : > { %v2806_v43 = vpack.c.bf16 %v2279_v59, %v2278_v2  ;;  %v2248_v14 = vadd.f32 %v2176_v61, %v1800_v37  ;;  %v3265_v29 = vpop.eup %3264  ;;  %v2195_v15 = vadd.f32 1.0, %v3263_v52  ;;  %v1801_v31 = vmax.f32 %v4404_v20, 0.0 }
 0x1fa   : > { %v3267_v46 = vpop.eup %3266  ;;  %v2179_v24 = vmul.f32 0.6931472, %v3265_v29  ;;  %v1932_v21 = vmul.f32 1.442695, %v1869_v17  ;;  %vm2184_vm13 = vcmp.lt.f32.partialorder %v2183_v44, 0.0004427343  ;;  %v1644_v33 = vadd.f32 %v4468_v36, %v3720_v42 }
 0x1fb   : > { %2834 = vst [vmem:[%s3847_s15 + $0x60] sm:$0xff] %v2806_v43   ;;  %v2280_v22 = vmul.f32 %v2248_v14, %v1768_v0  ;;  %v2190_v12 = vadd.f32 1.0, %v2189_v53  ;;  %3274 = vlog2.f32 %v2195_v15  ;;  %v2192_v30 = vand.u32 2147483647, %v4477_v62 }
 0x1fc   : > { %v2185_v25 = vsel %vm2184_vm13, %v2182_v63, %v2179_v24  ;;  %3276 = vpow2.f32 %v1932_v21  ;;  %v1769_v16 = vadd.f32 0.5, %v1737_v58  ;;  %v1738_v11 = vmul.f32 0.5, %v3267_v46 }
 0x1fd   : > { %v2249_v2 = vadd.f32 %v2185_v25, %v1801_v31  ;;  %v1676_v1 = vmul.f32 0.5, %v1642_v60  ;;  %v2198_v38 = vmul.f32 -0.5, %v3263_v52  ;;  %v2191_v20 = vmul.f32 %v4477_v62, %v2190_v12 }
 0x1fe   : > { %v1802_v35 = vmax.f32 %v4419_v18, 0.0  ;;  %vm2193_vm14 = vcmp.lt.f32.partialorder %v2192_v30, 0.0004427343  ;;  %v1770_v4 = vadd.f32 0.5, %v1738_v11  ;;  %v1677_v50 = vmul.f32 0.5, %v1644_v33 }
 0x1ff   : > { %v3269_v19 = vpop.eup %3268  ;;  %v2281_v13 = vmul.f32 %v2249_v2, %v1769_v16  ;;  %3278 = vtanh.f32 %v1676_v1  ;;  %v2199_v47 = vadd.f32 1.0, %v2198_v38  ;;  %v2201_v42 = vand.u32 2147483647, %v3263_v52 }
 0x200   : > { %v2188_v3 = vmul.f32 0.6931472, %v3269_v19  ;;  %v3271_v6 = vpop.eup %3270  ;;  %v1803_v57 = vmax.f32 %v4442_v56, 0.0  ;;  %v1804_v53 = vmax.f32 %v4464_v32, 0.0  ;;  %v1805_v24 = vmax.f32 %v4489_v54, 0.0 }
 0x201   : > { %v2811_v27 = vpack.c.bf16 %v2281_v13, %v2280_v22  ;;  %v3273_v41 = vpop.eup %3272  ;;  %v2204_v5 = vadd.f32 1.0, %v3271_v6  ;;  %v2200_v18 = vmul.f32 %v3263_v52, %v2199_v47  ;;  %vm2202_vm15 = vcmp.lt.f32.partialorder %v2201_v42, 0.0004427343 }
 0x202   : > { %v2194_v48 = vsel %vm2193_vm14, %v2191_v20, %v2188_v3  ;;  %v1739_v28 = vmul.f32 0.5, %v3273_v41  ;;  %v2207_v37 = vmul.f32 -0.5, %v3271_v6  ;;  %v2210_v49 = vand.u32 2147483647, %v3271_v6 }
 0x203   : > { %v2250_v26 = vadd.f32 %v2194_v48, %v1802_v35  ;;  %2835 = vst [vmem:[%s3847_s15 + $0x68] sm:$0xff] %v2811_v27   ;;  %3280 = vlog2.f32 %v2204_v5 }
 0x204   : > { %3282 = vtanh.f32 %v1677_v50  ;;  %v1771_v39 = vadd.f32 0.5, %v1739_v28  ;;  %v2208_v45 = vadd.f32 1.0, %v2207_v37  ;;  %vm2211_vm0 = vcmp.lt.f32.partialorder %v2210_v49, 0.0004427343 }
 0x205   : > { %v2282_v36 = vmul.f32 %v2250_v26, %v1770_v4  ;;  %v3275_v8 = vpop.eup %3274 }
 0x206   : > { %v3277_v62 = vpop.eup %3276  ;;  %v2197_v40 = vmul.f32 0.6931472, %v3275_v8  ;;  %v2209_v44 = vmul.f32 %v3271_v6, %v2208_v45 }
 0x207   : > { %v2213_v34 = vadd.f32 1.0, %v3277_v62  ;;  %v2216_v9 = vmul.f32 -0.5, %v3277_v62  ;;  %v2219_v14 = vand.u32 2147483647, %v3277_v62 }
 0x208   : > { %v2203_v10 = vsel %vm2202_vm15, %v2200_v18, %v2197_v40 }
 0x209   : > { %v2251_v7 = vadd.f32 %v2203_v10, %v1803_v57  ;;  %3284 = vlog2.f32 %v2213_v34  ;;  %v3279_v23 = vpop.eup %3278  ;;  %v2217_v52 = vadd.f32 1.0, %v2216_v9  ;;  %vm2220_vm1 = vcmp.lt.f32.partialorder %v2219_v14, 0.0004427343 }
 0x20a   : > { %v1740_v55 = vmul.f32 0.5, %v3279_v23 }
 0x20b   : > { %v2283_v0 = vmul.f32 %v2251_v7, %v1771_v39  ;;  %v2218_v22 = vmul.f32 %v3277_v62, %v2217_v52 }
 0x20c   : > { %v1772_v17 = vadd.f32 0.5, %v1740_v55 }
 0x20d   : > { %v2816_v59 = vpack.c.bf16 %v2283_v0, %v2282_v36  ;;  %v3281_v51 = vpop.eup %3280 }
 0x20e   : > { %v2206_v61 = vmul.f32 0.6931472, %v3281_v51  ;;  %v3283_v56 = vpop.eup %3282 }
 0x20f   : > { %2836 = vst [vmem:[%s3847_s15 + $0x70] sm:$0xff] %v2816_v59   ;;  %v1741_v15 = vmul.f32 0.5, %v3283_v56 }
 0x210   : > { %v2212_v43 = vsel %vm2211_vm0, %v2209_v44, %v2206_v61 }
 0x211   : > { %v2252_v29 = vadd.f32 %v2212_v43, %v1804_v53  ;;  %v1773_v63 = vadd.f32 0.5, %v1741_v15 }
 0x213   : > { %v3285_v58 = vpop.eup %3284  ;;  %v2284_v60 = vmul.f32 %v2252_v29, %v1772_v17 }
 0x214   : > { %v2215_v46 = vmul.f32 0.6931472, %v3285_v58 }
 0x216   : > { %v2221_v32 = vsel %vm2220_vm1, %v2218_v22, %v2215_v46 }
 0x217   : > { %v2253_v21 = vadd.f32 %v2221_v32, %v1805_v24 }
 0x219   : > { %v2285_v31 = vmul.f32 %v2253_v21, %v1773_v63 }
 0x21b   : > { %v2821_v12 = vpack.c.bf16 %v2285_v31, %v2284_v60 }
 0x21d   : > { %2837 = vst [vmem:[%s3847_s15 + $0x78] sm:$0xff] %v2821_v12  }
 0x21e   : > { %3299 = shalt.err (!%p3296_p3)
}
 0x21f   : > { %s3300_s19 = scalar_lea.hbm %s4515_s21, 2048  ;;  %s3304_s13 = scalar_lea.hbm %s4570_s7, 4096 }
 0x220   : > { %p3301_p4 = scmp.ne.s32.totalorder %s4515_s21, %s3300_s19  ;;  %p3305_p9 = scmp.lt.u32.totalorder %s4515_s21, %s4570_s7 }
 0x221   : > { %p3306_p10 = scmp.lt.u32.totalorder %s3304_s13, %s3300_s19  ;;  %p3308_p12 = scmp.lt.u32.totalorder %s3300_s19, %s4515_s21 }
 0x222   : > { %p3302_p7 = pnand %p3301_p4, %p3432_p5 }
 0x223   : > { %p3307_p11 = por %p3306_p10, %p3305_p9 }
 0x224   : > { %p3303_p8 = pneg %p3302_p7 }
 0x225   : > { %p3309_p13 = por %p3308_p12, %p3307_p11 }
 0x227   : > { %p3310_p0 = pnand %p3309_p13, %p3303_p8 }
 0x229   : > { %3313 = shalt.err (!%p3310_p0)
}
 0x22a   : > { %s3352_s17 = smov 64   ;;  %s3353_s20 = smov 4  }
 0x22b   : > { %2974 = dma.vmem_to_hbm [thread:$0]  (%p3432_p5), %s4517_s16, 2048, %s4515_s21, %s4522_s23, %s3352_s17, %s3352_s17, %s3353_s20  }
 0x22c PF: > { %p2980_p1 = scmp.ge.s32.totalorder %s3348_s27, 2  ;;  %s2475_s29 = sand.u32 1, %s3336_s24  }
 0x22d   : > { %s2476_s28 = scalar_lea.sflag [#allocation3], %s2475_s29 }
 0x22e   : > { %p2977_p2 = pnand %p2980_p1, %p3436_p6 }
 0x230   : > { %3331 = dma.done.wait (!%p2977_p2), %s2476_s28, 2048  }
 0x231   : > { %3333 = vsyncadd (!%p2977_p2), %s2476_s28, 4294965248  ;;  %p17_p3 = scmp.ge.s32.totalorder %s3419_s30, 4   ;;  %s4618_s24 = smov %s3340_s25 }
 0x232   : > { %s4619_s25 = smov %s3344_s26  ;;  %s4620_s26 = smov %s3430_s10 }
 0x233   : > { %s4621_s27 = smov %s3419_s30  ;;  %19 = sbr.rel (!%p17_p3) target bundleno = 3 (0x3), region = 89 }
 0x23a   :  { %2481 = vsyncpa [#allocation3], 1 }
 0x23b   :  { %2483 = vsyncpa [#allocation3 + $0x1], 1 }

</bundles_post_ra>
